<compile_context>
chip_gen: v5e
topology: v5e:2x2
jax: 0.10.0
libtpu: 0.0.40
codegen_flags: <defaults>
</compile_context>

<pallas_src>
import functools

import jax
import jax.numpy as jnp
from jax.experimental import pallas as pl
from jax.experimental.pallas import tpu as pltpu


def _ceil8(n):
    return ((n + 7) // 8) * 8


def _rows_per_group(c, wp, h, budget_bytes):
    """Rows per processing group so a (c, rows*wp) f32 tile stays within budget_bytes."""
    return max(1, min(h, budget_bytes // (4 * c * wp)))


def _col_fix_masks(c, ck, wp):
    """Boolean (c, ck) masks selecting padded column 0 / Wp-1 lanes of a row-aligned chunk."""
    col = jax.lax.broadcasted_iota(jnp.int32, (c, ck), 1) % wp
    return col == 0, col == (wp - 1)


def _fix_reflect_ring(m_ref, c, hp, wp, ring_rows):
    """Rebuild the reflect-padding ring of a padded (c, Hp*Wp + 2) VMEM buffer.

    Ordering (correctness-critical, see review):
      1) column reflect on padded rows 1..Hp-2: vectorized full-width shifted loads + jnp.where
         (also repairs the junk the conv slab stores leave in padded cols 0 / Wp-1),
      2) row reflect: rows 0 and Hp-1 copied from the now-fully-fixed rows 2 and Hp-3,
      3) finite tail columns (only read for discarded conv outputs).
    """
    L = hp * wp
    full_ck = ring_rows * wp
    mask0_f, maskw_f = _col_fix_masks(c, full_ck, wp)
    for r0 in range(1, hp - 1, ring_rows):
        rr = min(ring_rows, (hp - 1) - r0)
        ck = rr * wp
        off = r0 * wp
        if ck == full_ck:
            mask0, maskw = mask0_f, maskw_f
        else:
            mask0, maskw = _col_fix_masks(c, ck, wp)
        v = m_ref[:, off:off + ck]
        vp2 = m_ref[:, off + 2:off + 2 + ck]   # value at +2 lanes -> col 0    <- col 2
        vm2 = m_ref[:, off - 2:off - 2 + ck]   # value at -2 lanes -> col Wp-1 <- col Wp-3
        m_ref[:, off:off + ck] = jnp.where(mask0, vp2, jnp.where(maskw, vm2, v))
    # row reflect: padded row 0 <- padded row 2 ; padded row Hp-1 <- padded row Hp-3
    m_ref[:, 0:wp] = m_ref[:, 2 * wp:3 * wp]
    m_ref[:, (hp - 1) * wp:hp * wp] = m_ref[:, (hp - 3) * wp:(hp - 2) * wp]
    # finite tail columns (read only for discarded conv positions)
    m_ref[:, L:L + 2] = jnp.zeros((c, 2), m_ref.dtype)


def _convblock_kernel(x_ref, *refs, H, W, chans, relu_flags, row_groups, ring_rows):
    """Fused [conv3x3(reflect) -> BN(eval) -> ReLU] x n_layers for one image.

    x_ref : (1, C_in, H*W)  plain NCHW image (spatial flattened)
    per layer: w_ref (C_out, 9*ceil8(C_in)) tap-stacked, scale_ref (C_out,1), shift_ref (C_out,1)
    o_ref : (1, C_out_last, H*W)  plain NCHW output
    scratch: one padded (C, (H+2)*(W+2)+2) VMEM buffer per layer input + one staging buffer.
    """
    n_layers = len(relu_flags)
    hp, wp = H + 2, W + 2

    layer_refs = refs[:3 * n_layers]
    o_ref = refs[3 * n_layers]
    pad_refs = refs[3 * n_layers + 1:3 * n_layers + 1 + n_layers]
    stg_ref = refs[3 * n_layers + 1 + n_layers]
    stg_dtype = stg_ref.dtype

    # ---- build the reflect-padded layer-0 input in VMEM (no wrapper-side jnp.pad HBM pass) ----
    pad0 = pad_refs[0]
    for i in range(H):
        pad0[:, (i + 1) * wp + 1:(i + 1) * wp + 1 + W] = x_ref[0, :, i * W:(i + 1) * W]
    _fix_reflect_ring(pad0, chans[0], hp, wp, ring_rows[0])

    for li in range(n_layers):
        c_in, c_out = chans[li], chans[li + 1]
        c_in8 = _ceil8(c_in)
        k9 = 9 * c_in8
        w_ref = layer_refs[3 * li]
        sc_ref = layer_refs[3 * li + 1]
        sh_ref = layer_refs[3 * li + 2]
        src = pad_refs[li]
        last = li == n_layers - 1
        R = row_groups[li]
        nfull = R * wp

        # zero the K-padding bands of the staging buffer once per layer (sublane-aligned tap
        # bands of height ceil8(C_in); matching weight columns are zero).  Only when C_in % 8 != 0.
        if c_in8 != c_in:
            zpad = jnp.zeros((c_in8 - c_in, stg_ref.shape[1]), stg_dtype)
            for t in range(9):
                stg_ref[t * c_in8 + c_in:(t + 1) * c_in8, :] = zpad

        # hoist the per-channel scale/shift lane-broadcast out of the unrolled group loop,
        # but only while it stays register-cheap (a large broadcast would just spill).
        hoist = c_out * nfull * 4 <= 64 * 1024
        scb = jnp.broadcast_to(sc_ref[...], (c_out, nfull)) if hoist else None
        shb = jnp.broadcast_to(sh_ref[...], (c_out, nfull)) if hoist else None

        for i0 in range(0, H, R):
            rr = min(R, H - i0)
            ncols = rr * wp
            base = i0 * wp
            # stage the 9 shifted contiguous tap slices -> (9*ceil8(C_in), ncols)
            for dy in range(3):
                for dx in range(3):
                    t = 3 * dy + dx
                    off = base + dy * wp + dx
                    stg_ref[t * c_in8:t * c_in8 + c_in, :ncols] = (
                        src[:, off:off + ncols].astype(stg_dtype))
            # single MXU dot with K = 9*ceil8(C_in) (no accumulate chain, no zero init)
            acc = jnp.dot(w_ref[...], stg_ref[:k9, :ncols],
                          preferred_element_type=jnp.float32)
            if hoist and rr == R:
                y = acc * scb + shb
            else:
                y = acc * sc_ref[...] + sh_ref[...]          # folded conv-bias + BN(eval)
            if relu_flags[li]:
                y = jnp.maximum(y, 0.0)
            if last:
                # emit plain NCHW: per-row W-wide slices drop the 2 junk columns per row,
                # so the wrapper needs no de-pad slice (no extra HBM pass).
                for r in range(rr):
                    o_ref[0, :, (i0 + r) * W:(i0 + r) * W + W] = (
                        y[:, r * wp:r * wp + W].astype(o_ref.dtype))
            else:
                # contiguous slab store into the next layer's padded buffer (output (i,j) goes to
                # padded (i+1, j+1); cols j=W, W+1 write junk into the ring, repaired below).
                s0 = (i0 + 1) * wp + 1
                pad_refs[li + 1][:, s0:s0 + ncols] = y

        if not last:
            # ring repair strictly AFTER all of this layer's stores and BEFORE the next layer reads.
            _fix_reflect_ring(pad_refs[li + 1], c_out, hp, wp, ring_rows[li + 1])


def conv_block_pallas(x_flat, layer_params, *, H, W, chans, relu_flags, use_bf16=False):
    """x_flat: (N_img, C_in, H*W) f32 (NCHW, spatial flattened). Returns (N_img, C_out, H*W) f32."""
    n_img, c_in, hw = x_flat.shape
    assert hw == H * W and c_in == chans[0]
    hp, wp = H + 2, W + 2
    L2 = hp * wp + 2
    n_layers = len(relu_flags)
    c_last = chans[-1]

    # rows of output per MXU dot: keep the (C_out, R*Wp) f32 result tile ~<= 32 vregs
    row_groups = tuple(_rows_per_group(chans[li + 1], wp, H, 128 * 1024) for li in range(n_layers))
    # rows per ring-fix chunk (several (C, R*Wp) values live during the masked selects)
    ring_rows = tuple(_rows_per_group(chans[li], wp, hp - 2, 64 * 1024) for li in range(n_layers))

    stg_rows = max(9 * _ceil8(chans[li]) for li in range(n_layers))
    stg_cols = max(row_groups[li] * wp for li in range(n_layers))
    stg_dtype = jnp.bfloat16 if use_bf16 else jnp.float32

    kernel = functools.partial(
        _convblock_kernel, H=H, W=W, chans=tuple(chans), relu_flags=tuple(relu_flags),
        row_groups=row_groups, ring_rows=ring_rows)

    in_specs = [pl.BlockSpec((1, c_in, hw), lambda i: (i, 0, 0))]
    args = [x_flat]
    for wt, sc, sh in layer_params:
        wt = wt.astype(stg_dtype)
        in_specs.append(pl.BlockSpec(wt.shape, lambda i: (0, 0)))
        in_specs.append(pl.BlockSpec(sc.shape, lambda i: (0, 0)))
        in_specs.append(pl.BlockSpec(sh.shape, lambda i: (0, 0)))
        args += [wt, sc, sh]

    scratch_shapes = [pltpu.VMEM((chans[li], L2), jnp.float32) for li in range(n_layers)]
    scratch_shapes.append(pltpu.VMEM((stg_rows, stg_cols), stg_dtype))

    # derive the VMEM budget from the actual footprint (double-buffered I/O blocks + weights +
    # per-layer padded scratch + staging) instead of hard-coding 32 MiB.
    wsize = 2 if use_bf16 else 4
    footprint = (2 * c_in * hw * 4 + 2 * c_last * hw * 4
                 + sum(2 * (chans[i + 1] * 9 * _ceil8(chans[i]) * wsize + 2 * chans[i + 1] * 4)
                       for i in range(n_layers))
                 + sum(chans[i] * L2 * 4 for i in range(n_layers))
                 + stg_rows * stg_cols * wsize)
    vmem_limit = int(min(max(int(footprint * 1.5) + (2 << 20), 16 << 20), 120 << 20))

    return pl.pallas_call(
        kernel,
        out_shape=jax.ShapeDtypeStruct((n_img, c_last, hw), jnp.float32),
        grid=(n_img,),
        in_specs=in_specs,
        out_specs=pl.BlockSpec((1, c_last, hw), lambda i: (i, 0, 0)),
        scratch_shapes=scratch_shapes,
        compiler_params=pltpu.CompilerParams(
            # TODO(synk): on v7x switch to CORE_PARALLEL / pl.core_map for a guaranteed 2-TC split.
            dimension_semantics=("parallel",),
            vmem_limit_bytes=vmem_limit,
        ),
    )(*args)


# ----------------------------- Module wrapper --------------------------------------------------

class ConvBlockPallas:
    """Pallas port of ConvBlock (norm='batch' in eval mode, reflect padding, TemporallyShared)."""

    def __init__(self, nkernels, key, last_relu=True, eps=1e-5, use_bf16=False):
        self.nkernels = tuple(nkernels)
        self.use_bf16 = use_bf16
        n_layers = len(nkernels) - 1
        self.layer_params = []   # per layer: (w (C_out, 9*ceil8(C_in)), scale (C_out,1), shift (C_out,1))
        self.relu_flags = []
        self.raw_params = []     # for the pure-JAX reference check
        for i in range(n_layers):
            c_in, c_out = nkernels[i], nkernels[i + 1]
            key, kw, kb, kg, kbe, km, kv = jax.random.split(key, 7)
            w = jax.random.normal(kw, (c_out, c_in, 3, 3), jnp.float32) * 0.1
            b = jax.random.normal(kb, (c_out,), jnp.float32) * 0.1
            gamma = 1.0 + 0.1 * jax.random.normal(kg, (c_out,), jnp.float32)
            beta = 0.1 * jax.random.normal(kbe, (c_out,), jnp.float32)
            run_mean = 0.1 * jax.random.normal(km, (c_out,), jnp.float32)
            run_var = jnp.abs(1.0 + 0.1 * jax.random.normal(kv, (c_out,), jnp.float32))
            scale = gamma / jnp.sqrt(run_var + eps)
            shift = beta + (b - run_mean) * scale
            # (C_out, C_in, 3, 3) -> tap-stacked (C_out, 9*ceil8(C_in)); K index = (3*dy+dx)*ceil8(C_in)+ci,
            # zero-padded channels match the sublane-aligned staging layout in the kernel.
            c_in8 = _ceil8(c_in)
            w_t = jnp.transpose(w, (0, 2, 3, 1))                       # (C_out, 3, 3, C_in)
            w_t = jnp.pad(w_t, ((0, 0), (0, 0), (0, 0), (0, c_in8 - c_in)))
            w_k = w_t.reshape(c_out, 9 * c_in8)
            relu = last_relu or (i < n_layers - 1)
            self.layer_params.append((w_k, scale.reshape(-1, 1), shift.reshape(-1, 1)))
            self.relu_flags.append(relu)
            self.raw_params.append((w, b, gamma, beta, run_mean, run_var, eps, relu))
        self._forward = jax.jit(self._forward_impl)

    def _forward_impl(self, x_nchw):
        n, c, h, w = x_nchw.shape
        # the kernel performs the reflect padding AND the de-padding itself, so the wrapper is
        # reshape-only (no extra HBM passes around the pallas_call).
        out = conv_block_pallas(x_nchw.reshape(n, c, h * w), self.layer_params,
                                H=h, W=w, chans=self.nkernels, relu_flags=self.relu_flags,
                                use_bf16=self.use_bf16)
        return out.reshape(n, self.nkernels[-1], h, w)

    def forward(self, x_nchw):
        return self._forward(x_nchw)

    def smart_forward(self, x):
        # TemporallySharedBlock: 5-D (b, t, c, h, w) -> merge batch & time, shared convs, split back.
        # TODO(synk): pad_value masking branch of TemporallySharedBlock not implemented
        #             (data-dependent boolean indexing; default pad_value=None path only).
        if x.ndim == 4:
            return self.forward(x)
        b, t, c, h, w = x.shape
        out = self.forward(x.reshape(b * t, c, h, w))
        return out.reshape(b, t, out.shape[1], h, w)

    # pure-JAX reference (lax.conv) for correctness checking only
    def reference_forward(self, x_nchw):
        out = x_nchw
        for w, b, gamma, beta, run_mean, run_var, eps, relu in self.raw_params:
            xp = jnp.pad(out, ((0, 0), (0, 0), (1, 1), (1, 1)), mode="reflect")
            y = jax.lax.conv_general_dilated(
                xp, w, window_strides=(1, 1), padding="VALID",
                dimension_numbers=("NCHW", "OIHW", "NCHW"))
            y = y + b[None, :, None, None]
            y = (y - run_mean[None, :, None, None]) / jnp.sqrt(run_var + eps)[None, :, None, None]
            y = y * gamma[None, :, None, None] + beta[None, :, None, None]
            if relu:
                y = jnp.maximum(y, 0.0)
            out = y
        return out


if __name__ == "__main__":
    key = jax.random.PRNGKey(0)
    key, kparam, kx = jax.random.split(key, 3)

    nkernels = [4, 8, 8]          # in_channels=4, two conv layers with 8 output channels
    block = ConvBlockPallas(nkernels, kparam, last_relu=True)

    x = jax.random.normal(kx, (2, 4, 16, 16), jnp.float32)   # NCHW

    out = jax.block_until_ready(block.forward(x))
    ref = jax.block_until_ready(block.reference_forward(x))
    assert out.shape == ref.shape == (2, 8, 16, 16)
    assert jnp.allclose(out, ref, atol=1e-4, rtol=1e-4)

    # 5-D temporally-shared path (batch x time folding of TemporallySharedBlock)
    x5 = x.reshape(1, 2, 4, 16, 16)
    out5 = jax.block_until_ready(block.smart_forward(x5))
    assert out5.shape == (1, 2, 8, 16, 16)
    assert jnp.allclose(out5.reshape(2, 8, 16, 16), out, atol=1e-5, rtol=1e-5)

    print("KERNEL_OK")
</pallas_src>

<mosaic_0001>
module attributes {stable_mosaic.version = 11 : i64} {
  func.func @_convblock_kernel(%arg0: i32, %arg1: memref<1x4x256xf32, #tpu.memory_space<vmem>>, %arg2: memref<8x72xf32, #tpu.memory_space<vmem>>, %arg3: memref<8x1xf32, #tpu.memory_space<vmem>>, %arg4: memref<8x1xf32, #tpu.memory_space<vmem>>, %arg5: memref<8x72xf32, #tpu.memory_space<vmem>>, %arg6: memref<8x1xf32, #tpu.memory_space<vmem>>, %arg7: memref<8x1xf32, #tpu.memory_space<vmem>>, %arg8: memref<1x8x256xf32, #tpu.memory_space<vmem>>, %arg9: memref<4x326xf32, #tpu.memory_space<vmem>>, %arg10: memref<8x326xf32, #tpu.memory_space<vmem>>, %arg11: memref<72x288xf32, #tpu.memory_space<vmem>>) attributes {dimension_semantics = [#tpu.dimension_semantics<parallel>], iteration_bounds = array<i64: 2>, scalar_prefetch = 0 : i64, scratch_operands = 3 : i64, tpu.core_type = #tpu.core_type<tc>, window_params = [{transform_indices = @transform_0, window_bounds = array<i64: 1, 4, 256>}, {pipeline_mode = #tpu.pipeline_mode<synchronous>, transform_indices = @transform_1, window_bounds = array<i64: 8, 72>}, {pipeline_mode = #tpu.pipeline_mode<synchronous>, transform_indices = @transform_2, window_bounds = array<i64: 8, 1>}, {pipeline_mode = #tpu.pipeline_mode<synchronous>, transform_indices = @transform_3, window_bounds = array<i64: 8, 1>}, {pipeline_mode = #tpu.pipeline_mode<synchronous>, transform_indices = @transform_4, window_bounds = array<i64: 8, 72>}, {pipeline_mode = #tpu.pipeline_mode<synchronous>, transform_indices = @transform_5, window_bounds = array<i64: 8, 1>}, {pipeline_mode = #tpu.pipeline_mode<synchronous>, transform_indices = @transform_6, window_bounds = array<i64: 8, 1>}, {transform_indices = @transform_7, window_bounds = array<i64: 1, 8, 256>}]} {
    %c0 = arith.constant 0 : index
    %c0_0 = arith.constant 0 : index
    %c0_1 = arith.constant 0 : index
    %0 = vector.load %arg1[%c0, %c0_0, %c0_1] : memref<1x4x256xf32, #tpu.memory_space<vmem>>, vector<1x4x16xf32>
    %1 = vector.shape_cast %0 : vector<1x4x16xf32> to vector<4x16xf32>
    %c0_2 = arith.constant 0 : index
    %c19 = arith.constant 19 : index
    %2 = vector.load %arg9[%c0_2, %c19] : memref<4x326xf32, #tpu.memory_space<vmem>>, vector<4x16xf32>
    tpu.vector_store %arg9[%c0_2, %c19], %1 {strides = array<i32>} : memref<4x326xf32, #tpu.memory_space<vmem>>, vector<4x16xf32>,
    %c0_3 = arith.constant 0 : index
    %c0_4 = arith.constant 0 : index
    %c16 = arith.constant 16 : index
    %3 = vector.load %arg1[%c0_3, %c0_4, %c16] : memref<1x4x256xf32, #tpu.memory_space<vmem>>, vector<1x4x16xf32>
    %4 = vector.shape_cast %3 : vector<1x4x16xf32> to vector<4x16xf32>
    %c0_5 = arith.constant 0 : index
    %c37 = arith.constant 37 : index
    %5 = vector.load %arg9[%c0_5, %c37] : memref<4x326xf32, #tpu.memory_space<vmem>>, vector<4x16xf32>
    tpu.vector_store %arg9[%c0_5, %c37], %4 {strides = array<i32>} : memref<4x326xf32, #tpu.memory_space<vmem>>, vector<4x16xf32>,
    %c0_6 = arith.constant 0 : index
    %c0_7 = arith.constant 0 : index
    %c32 = arith.constant 32 : index
    %6 = vector.load %arg1[%c0_6, %c0_7, %c32] : memref<1x4x256xf32, #tpu.memory_space<vmem>>, vector<1x4x16xf32>
    %7 = vector.shape_cast %6 : vector<1x4x16xf32> to vector<4x16xf32>
    %c0_8 = arith.constant 0 : index
    %c55 = arith.constant 55 : index
    %8 = vector.load %arg9[%c0_8, %c55] : memref<4x326xf32, #tpu.memory_space<vmem>>, vector<4x16xf32>
    tpu.vector_store %arg9[%c0_8, %c55], %7 {strides = array<i32>} : memref<4x326xf32, #tpu.memory_space<vmem>>, vector<4x16xf32>,
    %c0_9 = arith.constant 0 : index
    %c0_10 = arith.constant 0 : index
    %c48 = arith.constant 48 : index
    %9 = vector.load %arg1[%c0_9, %c0_10, %c48] : memref<1x4x256xf32, #tpu.memory_space<vmem>>, vector<1x4x16xf32>
    %10 = vector.shape_cast %9 : vector<1x4x16xf32> to vector<4x16xf32>
    %c0_11 = arith.constant 0 : index
    %c73 = arith.constant 73 : index
    %11 = vector.load %arg9[%c0_11, %c73] : memref<4x326xf32, #tpu.memory_space<vmem>>, vector<4x16xf32>
    tpu.vector_store %arg9[%c0_11, %c73], %10 {strides = array<i32>} : memref<4x326xf32, #tpu.memory_space<vmem>>, vector<4x16xf32>,
    %c0_12 = arith.constant 0 : index
    %c0_13 = arith.constant 0 : index
    %c64 = arith.constant 64 : index
    %12 = vector.load %arg1[%c0_12, %c0_13, %c64] : memref<1x4x256xf32, #tpu.memory_space<vmem>>, vector<1x4x16xf32>
    %13 = vector.shape_cast %12 : vector<1x4x16xf32> to vector<4x16xf32>
    %c0_14 = arith.constant 0 : index
    %c91 = arith.constant 91 : index
    %14 = vector.load %arg9[%c0_14, %c91] : memref<4x326xf32, #tpu.memory_space<vmem>>, vector<4x16xf32>
    tpu.vector_store %arg9[%c0_14, %c91], %13 {strides = array<i32>} : memref<4x326xf32, #tpu.memory_space<vmem>>, vector<4x16xf32>,
    %c0_15 = arith.constant 0 : index
    %c0_16 = arith.constant 0 : index
    %c80 = arith.constant 80 : index
    %15 = vector.load %arg1[%c0_15, %c0_16, %c80] : memref<1x4x256xf32, #tpu.memory_space<vmem>>, vector<1x4x16xf32>
    %16 = vector.shape_cast %15 : vector<1x4x16xf32> to vector<4x16xf32>
    %c0_17 = arith.constant 0 : index
    %c109 = arith.constant 109 : index
    %17 = vector.load %arg9[%c0_17, %c109] : memref<4x326xf32, #tpu.memory_space<vmem>>, vector<4x16xf32>
    tpu.vector_store %arg9[%c0_17, %c109], %16 {strides = array<i32>} : memref<4x326xf32, #tpu.memory_space<vmem>>, vector<4x16xf32>,
    %c0_18 = arith.constant 0 : index
    %c0_19 = arith.constant 0 : index
    %c96 = arith.constant 96 : index
    %18 = vector.load %arg1[%c0_18, %c0_19, %c96] : memref<1x4x256xf32, #tpu.memory_space<vmem>>, vector<1x4x16xf32>
    %19 = vector.shape_cast %18 : vector<1x4x16xf32> to vector<4x16xf32>
    %c0_20 = arith.constant 0 : index
    %c127 = arith.constant 127 : index
    %20 = vector.load %arg9[%c0_20, %c127] : memref<4x326xf32, #tpu.memory_space<vmem>>, vector<4x16xf32>
    tpu.vector_store %arg9[%c0_20, %c127], %19 {strides = array<i32>} : memref<4x326xf32, #tpu.memory_space<vmem>>, vector<4x16xf32>,
    %c0_21 = arith.constant 0 : index
    %c0_22 = arith.constant 0 : index
    %c112 = arith.constant 112 : index
    %21 = vector.load %arg1[%c0_21, %c0_22, %c112] : memref<1x4x256xf32, #tpu.memory_space<vmem>>, vector<1x4x16xf32>
    %22 = vector.shape_cast %21 : vector<1x4x16xf32> to vector<4x16xf32>
    %c0_23 = arith.constant 0 : index
    %c145 = arith.constant 145 : index
    %23 = vector.load %arg9[%c0_23, %c145] : memref<4x326xf32, #tpu.memory_space<vmem>>, vector<4x16xf32>
    tpu.vector_store %arg9[%c0_23, %c145], %22 {strides = array<i32>} : memref<4x326xf32, #tpu.memory_space<vmem>>, vector<4x16xf32>,
    %c0_24 = arith.constant 0 : index
    %c0_25 = arith.constant 0 : index
    %c128 = arith.constant 128 : index
    %24 = vector.load %arg1[%c0_24, %c0_25, %c128] : memref<1x4x256xf32, #tpu.memory_space<vmem>>, vector<1x4x16xf32>
    %25 = vector.shape_cast %24 : vector<1x4x16xf32> to vector<4x16xf32>
    %c0_26 = arith.constant 0 : index
    %c163 = arith.constant 163 : index
    %26 = vector.load %arg9[%c0_26, %c163] : memref<4x326xf32, #tpu.memory_space<vmem>>, vector<4x16xf32>
    tpu.vector_store %arg9[%c0_26, %c163], %25 {strides = array<i32>} : memref<4x326xf32, #tpu.memory_space<vmem>>, vector<4x16xf32>,
    %c0_27 = arith.constant 0 : index
    %c0_28 = arith.constant 0 : index
    %c144 = arith.constant 144 : index
    %27 = vector.load %arg1[%c0_27, %c0_28, %c144] : memref<1x4x256xf32, #tpu.memory_space<vmem>>, vector<1x4x16xf32>
    %28 = vector.shape_cast %27 : vector<1x4x16xf32> to vector<4x16xf32>
    %c0_29 = arith.constant 0 : index
    %c181 = arith.constant 181 : index
    %29 = vector.load %arg9[%c0_29, %c181] : memref<4x326xf32, #tpu.memory_space<vmem>>, vector<4x16xf32>
    tpu.vector_store %arg9[%c0_29, %c181], %28 {strides = array<i32>} : memref<4x326xf32, #tpu.memory_space<vmem>>, vector<4x16xf32>,
    %c0_30 = arith.constant 0 : index
    %c0_31 = arith.constant 0 : index
    %c160 = arith.constant 160 : index
    %30 = vector.load %arg1[%c0_30, %c0_31, %c160] : memref<1x4x256xf32, #tpu.memory_space<vmem>>, vector<1x4x16xf32>
    %31 = vector.shape_cast %30 : vector<1x4x16xf32> to vector<4x16xf32>
    %c0_32 = arith.constant 0 : index
    %c199 = arith.constant 199 : index
    %32 = vector.load %arg9[%c0_32, %c199] : memref<4x326xf32, #tpu.memory_space<vmem>>, vector<4x16xf32>
    tpu.vector_store %arg9[%c0_32, %c199], %31 {strides = array<i32>} : memref<4x326xf32, #tpu.memory_space<vmem>>, vector<4x16xf32>,
    %c0_33 = arith.constant 0 : index
    %c0_34 = arith.constant 0 : index
    %c176 = arith.constant 176 : index
    %33 = vector.load %arg1[%c0_33, %c0_34, %c176] : memref<1x4x256xf32, #tpu.memory_space<vmem>>, vector<1x4x16xf32>
    %34 = vector.shape_cast %33 : vector<1x4x16xf32> to vector<4x16xf32>
    %c0_35 = arith.constant 0 : index
    %c217 = arith.constant 217 : index
    %35 = vector.load %arg9[%c0_35, %c217] : memref<4x326xf32, #tpu.memory_space<vmem>>, vector<4x16xf32>
    tpu.vector_store %arg9[%c0_35, %c217], %34 {strides = array<i32>} : memref<4x326xf32, #tpu.memory_space<vmem>>, vector<4x16xf32>,
    %c0_36 = arith.constant 0 : index
    %c0_37 = arith.constant 0 : index
    %c192 = arith.constant 192 : index
    %36 = vector.load %arg1[%c0_36, %c0_37, %c192] : memref<1x4x256xf32, #tpu.memory_space<vmem>>, vector<1x4x16xf32>
    %37 = vector.shape_cast %36 : vector<1x4x16xf32> to vector<4x16xf32>
    %c0_38 = arith.constant 0 : index
    %c235 = arith.constant 235 : index
    %38 = vector.load %arg9[%c0_38, %c235] : memref<4x326xf32, #tpu.memory_space<vmem>>, vector<4x16xf32>
    tpu.vector_store %arg9[%c0_38, %c235], %37 {strides = array<i32>} : memref<4x326xf32, #tpu.memory_space<vmem>>, vector<4x16xf32>,
    %c0_39 = arith.constant 0 : index
    %c0_40 = arith.constant 0 : index
    %c208 = arith.constant 208 : index
    %39 = vector.load %arg1[%c0_39, %c0_40, %c208] : memref<1x4x256xf32, #tpu.memory_space<vmem>>, vector<1x4x16xf32>
    %40 = vector.shape_cast %39 : vector<1x4x16xf32> to vector<4x16xf32>
    %c0_41 = arith.constant 0 : index
    %c253 = arith.constant 253 : index
    %41 = vector.load %arg9[%c0_41, %c253] : memref<4x326xf32, #tpu.memory_space<vmem>>, vector<4x16xf32>
    tpu.vector_store %arg9[%c0_41, %c253], %40 {strides = array<i32>} : memref<4x326xf32, #tpu.memory_space<vmem>>, vector<4x16xf32>,
    %c0_42 = arith.constant 0 : index
    %c0_43 = arith.constant 0 : index
    %c224 = arith.constant 224 : index
    %42 = vector.load %arg1[%c0_42, %c0_43, %c224] : memref<1x4x256xf32, #tpu.memory_space<vmem>>, vector<1x4x16xf32>
    %43 = vector.shape_cast %42 : vector<1x4x16xf32> to vector<4x16xf32>
    %c0_44 = arith.constant 0 : index
    %c271 = arith.constant 271 : index
    %44 = vector.load %arg9[%c0_44, %c271] : memref<4x326xf32, #tpu.memory_space<vmem>>, vector<4x16xf32>
    tpu.vector_store %arg9[%c0_44, %c271], %43 {strides = array<i32>} : memref<4x326xf32, #tpu.memory_space<vmem>>, vector<4x16xf32>,
    %c0_45 = arith.constant 0 : index
    %c0_46 = arith.constant 0 : index
    %c240 = arith.constant 240 : index
    %45 = vector.load %arg1[%c0_45, %c0_46, %c240] : memref<1x4x256xf32, #tpu.memory_space<vmem>>, vector<1x4x16xf32>
    %46 = vector.shape_cast %45 : vector<1x4x16xf32> to vector<4x16xf32>
    %c0_47 = arith.constant 0 : index
    %c289 = arith.constant 289 : index
    %47 = vector.load %arg9[%c0_47, %c289] : memref<4x326xf32, #tpu.memory_space<vmem>>, vector<4x16xf32>
    tpu.vector_store %arg9[%c0_47, %c289], %46 {strides = array<i32>} : memref<4x326xf32, #tpu.memory_space<vmem>>, vector<4x16xf32>,
    %48 = tpu.iota {dimensions = array<i32: 1>} : vector<4x288xi32>
    %c18_i32 = arith.constant 18 : i32
    %c0_i32 = arith.constant 0 : i32
    %49 = arith.cmpi eq, %c18_i32, %c0_i32 : i32
    %c1_i32 = arith.constant 1 : i32
    %50 = arith.select %49, %c1_i32, %c18_i32 : i32
    %51 = vector.broadcast %50 : i32 to vector<4x288xi32>
    %52 = arith.remsi %48, %51 : vector<4x288xi32>
    %c0_i32_48 = arith.constant 0 : i32
    %53 = vector.broadcast %c0_i32_48 : i32 to vector<4x288xi32>
    %54 = arith.cmpi ne, %52, %53 : vector<4x288xi32>
    %c0_i32_49 = arith.constant 0 : i32
    %55 = vector.broadcast %c0_i32_49 : i32 to vector<4x288xi32>
    %56 = arith.cmpi slt, %52, %55 : vector<4x288xi32>
    %c0_i32_50 = arith.constant 0 : i32
    %57 = arith.cmpi slt, %50, %c0_i32_50 : i32
    %58 = vector.broadcast %57 : i1 to vector<4x288xi1>
    %59 = vector.broadcast %58 : vector<4x288xi1> to vector<4x288xi1>
    %60 = arith.xori %56, %59 : vector<4x288xi1>
    %61 = arith.andi %60, %54 : vector<4x288xi1>
    %62 = vector.broadcast %50 : i32 to vector<4x288xi32>
    %63 = arith.addi %52, %62 : vector<4x288xi32>
    %64 = arith.select %61, %63, %52 : vector<4x288xi1>, vector<4x288xi32>
    %c0_i32_51 = arith.constant 0 : i32
    %65 = vector.broadcast %c0_i32_51 : i32 to vector<4x288xi32>
    %66 = arith.cmpi eq, %64, %65 : vector<4x288xi32>
    %c17_i32 = arith.constant 17 : i32
    %67 = vector.broadcast %c17_i32 : i32 to vector<4x288xi32>
    %68 = arith.cmpi eq, %64, %67 : vector<4x288xi32>
    %c0_52 = arith.constant 0 : index
    %c18 = arith.constant 18 : index
    %69 = vector.load %arg9[%c0_52, %c18] : memref<4x326xf32, #tpu.memory_space<vmem>>, vector<4x288xf32>
    %c0_53 = arith.constant 0 : index
    %c20 = arith.constant 20 : index
    %70 = vector.load %arg9[%c0_53, %c20] : memref<4x326xf32, #tpu.memory_space<vmem>>, vector<4x288xf32>
    %c0_54 = arith.constant 0 : index
    %c16_55 = arith.constant 16 : index
    %71 = vector.load %arg9[%c0_54, %c16_55] : memref<4x326xf32, #tpu.memory_space<vmem>>, vector<4x288xf32>
    %72 = arith.select %68, %71, %69 : vector<4x288xi1>, vector<4x288xf32>
    %73 = arith.select %66, %70, %72 : vector<4x288xi1>, vector<4x288xf32>
    %c0_56 = arith.constant 0 : index
    %c18_57 = arith.constant 18 : index
    %74 = vector.load %arg9[%c0_56, %c18_57] : memref<4x326xf32, #tpu.memory_space<vmem>>, vector<4x288xf32>
    tpu.vector_store %arg9[%c0_56, %c18_57], %73 {strides = array<i32>} : memref<4x326xf32, #tpu.memory_space<vmem>>, vector<4x288xf32>,
    %c0_58 = arith.constant 0 : index
    %c36 = arith.constant 36 : index
    %75 = vector.load %arg9[%c0_58, %c36] : memref<4x326xf32, #tpu.memory_space<vmem>>, vector<4x18xf32>
    %c0_59 = arith.constant 0 : index
    %c0_60 = arith.constant 0 : index
    %76 = vector.load %arg9[%c0_59, %c0_60] : memref<4x326xf32, #tpu.memory_space<vmem>>, vector<4x18xf32>
    tpu.vector_store %arg9[%c0_59, %c0_60], %75 {strides = array<i32>} : memref<4x326xf32, #tpu.memory_space<vmem>>, vector<4x18xf32>,
    %c0_61 = arith.constant 0 : index
    %c270 = arith.constant 270 : index
    %77 = vector.load %arg9[%c0_61, %c270] : memref<4x326xf32, #tpu.memory_space<vmem>>, vector<4x18xf32>
    %c0_62 = arith.constant 0 : index
    %c306 = arith.constant 306 : index
    %78 = vector.load %arg9[%c0_62, %c306] : memref<4x326xf32, #tpu.memory_space<vmem>>, vector<4x18xf32>
    tpu.vector_store %arg9[%c0_62, %c306], %77 {strides = array<i32>} : memref<4x326xf32, #tpu.memory_space<vmem>>, vector<4x18xf32>,
    %cst = arith.constant 0.000000e+00 : f32
    %79 = vector.broadcast %cst : f32 to vector<4x2xf32>
    %c0_63 = arith.constant 0 : index
    %c324 = arith.constant 324 : index
    %80 = vector.load %arg9[%c0_63, %c324] : memref<4x326xf32, #tpu.memory_space<vmem>>, vector<4x2xf32>
    tpu.vector_store %arg9[%c0_63, %c324], %79 {strides = array<i32>} : memref<4x326xf32, #tpu.memory_space<vmem>>, vector<4x2xf32>,
    %cst_64 = arith.constant 0.000000e+00 : f32
    %81 = vector.broadcast %cst_64 : f32 to vector<4x288xf32>
    %c4 = arith.constant 4 : index
    %c0_65 = arith.constant 0 : index
    %82 = vector.load %arg11[%c4, %c0_65] : memref<72x288xf32, #tpu.memory_space<vmem>>, vector<4x288xf32>
    tpu.vector_store %arg11[%c4, %c0_65], %81 {strides = array<i32>} : memref<72x288xf32, #tpu.memory_space<vmem>>, vector<4x288xf32>,
    %c12 = arith.constant 12 : index
    %c0_66 = arith.constant 0 : index
    %83 = vector.load %arg11[%c12, %c0_66] : memref<72x288xf32, #tpu.memory_space<vmem>>, vector<4x288xf32>
    tpu.vector_store %arg11[%c12, %c0_66], %81 {strides = array<i32>} : memref<72x288xf32, #tpu.memory_space<vmem>>, vector<4x288xf32>,
    %c20_67 = arith.constant 20 : index
    %c0_68 = arith.constant 0 : index
    %84 = vector.load %arg11[%c20_67, %c0_68] : memref<72x288xf32, #tpu.memory_space<vmem>>, vector<4x288xf32>
    tpu.vector_store %arg11[%c20_67, %c0_68], %81 {strides = array<i32>} : memref<72x288xf32, #tpu.memory_space<vmem>>, vector<4x288xf32>,
    %c28 = arith.constant 28 : index
    %c0_69 = arith.constant 0 : index
    %85 = vector.load %arg11[%c28, %c0_69] : memref<72x288xf32, #tpu.memory_space<vmem>>, vector<4x288xf32>
    tpu.vector_store %arg11[%c28, %c0_69], %81 {strides = array<i32>} : memref<72x288xf32, #tpu.memory_space<vmem>>, vector<4x288xf32>,
    %c36_70 = arith.constant 36 : index
    %c0_71 = arith.constant 0 : index
    %86 = vector.load %arg11[%c36_70, %c0_71] : memref<72x288xf32, #tpu.memory_space<vmem>>, vector<4x288xf32>
    tpu.vector_store %arg11[%c36_70, %c0_71], %81 {strides = array<i32>} : memref<72x288xf32, #tpu.memory_space<vmem>>, vector<4x288xf32>,
    %c44 = arith.constant 44 : index
    %c0_72 = arith.constant 0 : index
    %87 = vector.load %arg11[%c44, %c0_72] : memref<72x288xf32, #tpu.memory_space<vmem>>, vector<4x288xf32>
    tpu.vector_store %arg11[%c44, %c0_72], %81 {strides = array<i32>} : memref<72x288xf32, #tpu.memory_space<vmem>>, vector<4x288xf32>,
    %c52 = arith.constant 52 : index
    %c0_73 = arith.constant 0 : index
    %88 = vector.load %arg11[%c52, %c0_73] : memref<72x288xf32, #tpu.memory_space<vmem>>, vector<4x288xf32>
    tpu.vector_store %arg11[%c52, %c0_73], %81 {strides = array<i32>} : memref<72x288xf32, #tpu.memory_space<vmem>>, vector<4x288xf32>,
    %c60 = arith.constant 60 : index
    %c0_74 = arith.constant 0 : index
    %89 = vector.load %arg11[%c60, %c0_74] : memref<72x288xf32, #tpu.memory_space<vmem>>, vector<4x288xf32>
    tpu.vector_store %arg11[%c60, %c0_74], %81 {strides = array<i32>} : memref<72x288xf32, #tpu.memory_space<vmem>>, vector<4x288xf32>,
    %c68 = arith.constant 68 : index
    %c0_75 = arith.constant 0 : index
    %90 = vector.load %arg11[%c68, %c0_75] : memref<72x288xf32, #tpu.memory_space<vmem>>, vector<4x288xf32>
    tpu.vector_store %arg11[%c68, %c0_75], %81 {strides = array<i32>} : memref<72x288xf32, #tpu.memory_space<vmem>>, vector<4x288xf32>,
    %c0_76 = arith.constant 0 : index
    %c0_77 = arith.constant 0 : index
    %91 = vector.load %arg3[%c0_76, %c0_77] : memref<8x1xf32, #tpu.memory_space<vmem>>, vector<8x1xf32>
    %92 = vector.shape_cast %91 : vector<8x1xf32> to vector<8x1xf32>
    %93 = vector.broadcast %92 : vector<8x1xf32> to vector<8x288xf32>
    %c0_78 = arith.constant 0 : index
    %c0_79 = arith.constant 0 : index
    %94 = vector.load %arg4[%c0_78, %c0_79] : memref<8x1xf32, #tpu.memory_space<vmem>>, vector<8x1xf32>
    %95 = vector.shape_cast %94 : vector<8x1xf32> to vector<8x1xf32>
    %96 = vector.broadcast %95 : vector<8x1xf32> to vector<8x288xf32>
    %c0_80 = arith.constant 0 : index
    %c0_81 = arith.constant 0 : index
    %97 = vector.load %arg9[%c0_80, %c0_81] : memref<4x326xf32, #tpu.memory_space<vmem>>, vector<4x288xf32>
    %c0_82 = arith.constant 0 : index
    %c0_83 = arith.constant 0 : index
    %98 = vector.load %arg11[%c0_82, %c0_83] : memref<72x288xf32, #tpu.memory_space<vmem>>, vector<4x288xf32>
    tpu.vector_store %arg11[%c0_82, %c0_83], %97 {strides = array<i32>} : memref<72x288xf32, #tpu.memory_space<vmem>>, vector<4x288xf32>,
    %c0_84 = arith.constant 0 : index
    %c1 = arith.constant 1 : index
    %99 = vector.load %arg9[%c0_84, %c1] : memref<4x326xf32, #tpu.memory_space<vmem>>, vector<4x288xf32>
    %c8 = arith.constant 8 : index
    %c0_85 = arith.constant 0 : index
    %100 = vector.load %arg11[%c8, %c0_85] : memref<72x288xf32, #tpu.memory_space<vmem>>, vector<4x288xf32>
    tpu.vector_store %arg11[%c8, %c0_85], %99 {strides = array<i32>} : memref<72x288xf32, #tpu.memory_space<vmem>>, vector<4x288xf32>,
    %c0_86 = arith.constant 0 : index
    %c2 = arith.constant 2 : index
    %101 = vector.load %arg9[%c0_86, %c2] : memref<4x326xf32, #tpu.memory_space<vmem>>, vector<4x288xf32>
    %c16_87 = arith.constant 16 : index
    %c0_88 = arith.constant 0 : index
    %102 = vector.load %arg11[%c16_87, %c0_88] : memref<72x288xf32, #tpu.memory_space<vmem>>, vector<4x288xf32>
    tpu.vector_store %arg11[%c16_87, %c0_88], %101 {strides = array<i32>} : memref<72x288xf32, #tpu.memory_space<vmem>>, vector<4x288xf32>,
    %c0_89 = arith.constant 0 : index
    %c18_90 = arith.constant 18 : index
    %103 = vector.load %arg9[%c0_89, %c18_90] : memref<4x326xf32, #tpu.memory_space<vmem>>, vector<4x288xf32>
    %c24 = arith.constant 24 : index
    %c0_91 = arith.constant 0 : index
    %104 = vector.load %arg11[%c24, %c0_91] : memref<72x288xf32, #tpu.memory_space<vmem>>, vector<4x288xf32>
    tpu.vector_store %arg11[%c24, %c0_91], %103 {strides = array<i32>} : memref<72x288xf32, #tpu.memory_space<vmem>>, vector<4x288xf32>,
    %c0_92 = arith.constant 0 : index
    %c19_93 = arith.constant 19 : index
    %105 = vector.load %arg9[%c0_92, %c19_93] : memref<4x326xf32, #tpu.memory_space<vmem>>, vector<4x288xf32>
    %c32_94 = arith.constant 32 : index
    %c0_95 = arith.constant 0 : index
    %106 = vector.load %arg11[%c32_94, %c0_95] : memref<72x288xf32, #tpu.memory_space<vmem>>, vector<4x288xf32>
    tpu.vector_store %arg11[%c32_94, %c0_95], %105 {strides = array<i32>} : memref<72x288xf32, #tpu.memory_space<vmem>>, vector<4x288xf32>,
    %c0_96 = arith.constant 0 : index
    %c20_97 = arith.constant 20 : index
    %107 = vector.load %arg9[%c0_96, %c20_97] : memref<4x326xf32, #tpu.memory_space<vmem>>, vector<4x288xf32>
    %c40 = arith.constant 40 : index
    %c0_98 = arith.constant 0 : index
    %108 = vector.load %arg11[%c40, %c0_98] : memref<72x288xf32, #tpu.memory_space<vmem>>, vector<4x288xf32>
    tpu.vector_store %arg11[%c40, %c0_98], %107 {strides = array<i32>} : memref<72x288xf32, #tpu.memory_space<vmem>>, vector<4x288xf32>,
    %c0_99 = arith.constant 0 : index
    %c36_100 = arith.constant 36 : index
    %109 = vector.load %arg9[%c0_99, %c36_100] : memref<4x326xf32, #tpu.memory_space<vmem>>, vector<4x288xf32>
    %c48_101 = arith.constant 48 : index
    %c0_102 = arith.constant 0 : index
    %110 = vector.load %arg11[%c48_101, %c0_102] : memref<72x288xf32, #tpu.memory_space<vmem>>, vector<4x288xf32>
    tpu.vector_store %arg11[%c48_101, %c0_102], %109 {strides = array<i32>} : memref<72x288xf32, #tpu.memory_space<vmem>>, vector<4x288xf32>,
    %c0_103 = arith.constant 0 : index
    %c37_104 = arith.constant 37 : index
    %111 = vector.load %arg9[%c0_103, %c37_104] : memref<4x326xf32, #tpu.memory_space<vmem>>, vector<4x288xf32>
    %c56 = arith.constant 56 : index
    %c0_105 = arith.constant 0 : index
    %112 = vector.load %arg11[%c56, %c0_105] : memref<72x288xf32, #tpu.memory_space<vmem>>, vector<4x288xf32>
    tpu.vector_store %arg11[%c56, %c0_105], %111 {strides = array<i32>} : memref<72x288xf32, #tpu.memory_space<vmem>>, vector<4x288xf32>,
    %c0_106 = arith.constant 0 : index
    %c38 = arith.constant 38 : index
    %113 = vector.load %arg9[%c0_106, %c38] : memref<4x326xf32, #tpu.memory_space<vmem>>, vector<4x288xf32>
    %c64_107 = arith.constant 64 : index
    %c0_108 = arith.constant 0 : index
    %114 = vector.load %arg11[%c64_107, %c0_108] : memref<72x288xf32, #tpu.memory_space<vmem>>, vector<4x288xf32>
    tpu.vector_store %arg11[%c64_107, %c0_108], %113 {strides = array<i32>} : memref<72x288xf32, #tpu.memory_space<vmem>>, vector<4x288xf32>,
    %c0_109 = arith.constant 0 : index
    %c0_110 = arith.constant 0 : index
    %115 = vector.load %arg2[%c0_109, %c0_110] : memref<8x72xf32, #tpu.memory_space<vmem>>, vector<8x72xf32>
    %c0_111 = arith.constant 0 : index
    %c0_112 = arith.constant 0 : index
    %116 = vector.load %arg11[%c0_111, %c0_112] : memref<72x288xf32, #tpu.memory_space<vmem>>, vector<72x288xf32>
    %cst_113 = arith.constant dense<0.000000e+00> : vector<8x288xf32>
    %117 = tpu.matmul %115, %116, %cst_113 {dimension_numbers = #tpu.dot_dimension_numbers<[1], [0], [0], [1], [0, 0, 1, 1], [], []>} : vector<8x72xf32>, vector<72x288xf32>, vector<8x288xf32> -> vector<8x288xf32>
    %118 = arith.mulf %117, %93 : vector<8x288xf32>
    %119 = arith.addf %118, %96 : vector<8x288xf32>
    %cst_114 = arith.constant 0.000000e+00 : f32
    %120 = vector.broadcast %cst_114 : f32 to vector<8x288xf32>
    %121 = arith.maximumf %119, %120 : vector<8x288xf32>
    %c0_115 = arith.constant 0 : index
    %c19_116 = arith.constant 19 : index
    %122 = vector.load %arg10[%c0_115, %c19_116] : memref<8x326xf32, #tpu.memory_space<vmem>>, vector<8x288xf32>
    tpu.vector_store %arg10[%c0_115, %c19_116], %121 {strides = array<i32>} : memref<8x326xf32, #tpu.memory_space<vmem>>, vector<8x288xf32>,
    %123 = tpu.iota {dimensions = array<i32: 1>} : vector<8x288xi32>
    %c18_i32_117 = arith.constant 18 : i32
    %c0_i32_118 = arith.constant 0 : i32
    %124 = arith.cmpi eq, %c18_i32_117, %c0_i32_118 : i32
    %c1_i32_119 = arith.constant 1 : i32
    %125 = arith.select %124, %c1_i32_119, %c18_i32_117 : i32
    %126 = vector.broadcast %125 : i32 to vector<8x288xi32>
    %127 = arith.remsi %123, %126 : vector<8x288xi32>
    %c0_i32_120 = arith.constant 0 : i32
    %128 = vector.broadcast %c0_i32_120 : i32 to vector<8x288xi32>
    %129 = arith.cmpi ne, %127, %128 : vector<8x288xi32>
    %c0_i32_121 = arith.constant 0 : i32
    %130 = vector.broadcast %c0_i32_121 : i32 to vector<8x288xi32>
    %131 = arith.cmpi slt, %127, %130 : vector<8x288xi32>
    %c0_i32_122 = arith.constant 0 : i32
    %132 = arith.cmpi slt, %125, %c0_i32_122 : i32
    %133 = vector.broadcast %132 : i1 to vector<8x288xi1>
    %134 = vector.broadcast %133 : vector<8x288xi1> to vector<8x288xi1>
    %135 = arith.xori %131, %134 : vector<8x288xi1>
    %136 = arith.andi %135, %129 : vector<8x288xi1>
    %137 = vector.broadcast %125 : i32 to vector<8x288xi32>
    %138 = arith.addi %127, %137 : vector<8x288xi32>
    %139 = arith.select %136, %138, %127 : vector<8x288xi1>, vector<8x288xi32>
    %c0_i32_123 = arith.constant 0 : i32
    %140 = vector.broadcast %c0_i32_123 : i32 to vector<8x288xi32>
    %141 = arith.cmpi eq, %139, %140 : vector<8x288xi32>
    %c17_i32_124 = arith.constant 17 : i32
    %142 = vector.broadcast %c17_i32_124 : i32 to vector<8x288xi32>
    %143 = arith.cmpi eq, %139, %142 : vector<8x288xi32>
    %c0_125 = arith.constant 0 : index
    %c18_126 = arith.constant 18 : index
    %144 = vector.load %arg10[%c0_125, %c18_126] : memref<8x326xf32, #tpu.memory_space<vmem>>, vector<8x288xf32>
    %c0_127 = arith.constant 0 : index
    %c20_128 = arith.constant 20 : index
    %145 = vector.load %arg10[%c0_127, %c20_128] : memref<8x326xf32, #tpu.memory_space<vmem>>, vector<8x288xf32>
    %c0_129 = arith.constant 0 : index
    %c16_130 = arith.constant 16 : index
    %146 = vector.load %arg10[%c0_129, %c16_130] : memref<8x326xf32, #tpu.memory_space<vmem>>, vector<8x288xf32>
    %147 = arith.select %143, %146, %144 : vector<8x288xi1>, vector<8x288xf32>
    %148 = arith.select %141, %145, %147 : vector<8x288xi1>, vector<8x288xf32>
    %c0_131 = arith.constant 0 : index
    %c18_132 = arith.constant 18 : index
    %149 = vector.load %arg10[%c0_131, %c18_132] : memref<8x326xf32, #tpu.memory_space<vmem>>, vector<8x288xf32>
    tpu.vector_store %arg10[%c0_131, %c18_132], %148 {strides = array<i32>} : memref<8x326xf32, #tpu.memory_space<vmem>>, vector<8x288xf32>,
    %c0_133 = arith.constant 0 : index
    %c36_134 = arith.constant 36 : index
    %150 = vector.load %arg10[%c0_133, %c36_134] : memref<8x326xf32, #tpu.memory_space<vmem>>, vector<8x18xf32>
    %c0_135 = arith.constant 0 : index
    %c0_136 = arith.constant 0 : index
    %151 = vector.load %arg10[%c0_135, %c0_136] : memref<8x326xf32, #tpu.memory_space<vmem>>, vector<8x18xf32>
    tpu.vector_store %arg10[%c0_135, %c0_136], %150 {strides = array<i32>} : memref<8x326xf32, #tpu.memory_space<vmem>>, vector<8x18xf32>,
    %c0_137 = arith.constant 0 : index
    %c270_138 = arith.constant 270 : index
    %152 = vector.load %arg10[%c0_137, %c270_138] : memref<8x326xf32, #tpu.memory_space<vmem>>, vector<8x18xf32>
    %c0_139 = arith.constant 0 : index
    %c306_140 = arith.constant 306 : index
    %153 = vector.load %arg10[%c0_139, %c306_140] : memref<8x326xf32, #tpu.memory_space<vmem>>, vector<8x18xf32>
    tpu.vector_store %arg10[%c0_139, %c306_140], %152 {strides = array<i32>} : memref<8x326xf32, #tpu.memory_space<vmem>>, vector<8x18xf32>,
    %cst_141 = arith.constant 0.000000e+00 : f32
    %154 = vector.broadcast %cst_141 : f32 to vector<8x2xf32>
    %c0_142 = arith.constant 0 : index
    %c324_143 = arith.constant 324 : index
    %155 = vector.load %arg10[%c0_142, %c324_143] : memref<8x326xf32, #tpu.memory_space<vmem>>, vector<8x2xf32>
    tpu.vector_store %arg10[%c0_142, %c324_143], %154 {strides = array<i32>} : memref<8x326xf32, #tpu.memory_space<vmem>>, vector<8x2xf32>,
    %c0_144 = arith.constant 0 : index
    %c0_145 = arith.constant 0 : index
    %156 = vector.load %arg6[%c0_144, %c0_145] : memref<8x1xf32, #tpu.memory_space<vmem>>, vector<8x1xf32>
    %157 = vector.shape_cast %156 : vector<8x1xf32> to vector<8x1xf32>
    %158 = vector.broadcast %157 : vector<8x1xf32> to vector<8x288xf32>
    %c0_146 = arith.constant 0 : index
    %c0_147 = arith.constant 0 : index
    %159 = vector.load %arg7[%c0_146, %c0_147] : memref<8x1xf32, #tpu.memory_space<vmem>>, vector<8x1xf32>
    %160 = vector.shape_cast %159 : vector<8x1xf32> to vector<8x1xf32>
    %161 = vector.broadcast %160 : vector<8x1xf32> to vector<8x288xf32>
    %c0_148 = arith.constant 0 : index
    %c0_149 = arith.constant 0 : index
    %162 = vector.load %arg10[%c0_148, %c0_149] : memref<8x326xf32, #tpu.memory_space<vmem>>, vector<8x288xf32>
    %c0_150 = arith.constant 0 : index
    %c0_151 = arith.constant 0 : index
    %163 = vector.load %arg11[%c0_150, %c0_151] : memref<72x288xf32, #tpu.memory_space<vmem>>, vector<8x288xf32>
    tpu.vector_store %arg11[%c0_150, %c0_151], %162 {strides = array<i32>} : memref<72x288xf32, #tpu.memory_space<vmem>>, vector<8x288xf32>,
    %c0_152 = arith.constant 0 : index
    %c1_153 = arith.constant 1 : index
    %164 = vector.load %arg10[%c0_152, %c1_153] : memref<8x326xf32, #tpu.memory_space<vmem>>, vector<8x288xf32>
    %c8_154 = arith.constant 8 : index
    %c0_155 = arith.constant 0 : index
    %165 = vector.load %arg11[%c8_154, %c0_155] : memref<72x288xf32, #tpu.memory_space<vmem>>, vector<8x288xf32>
    tpu.vector_store %arg11[%c8_154, %c0_155], %164 {strides = array<i32>} : memref<72x288xf32, #tpu.memory_space<vmem>>, vector<8x288xf32>,
    %c0_156 = arith.constant 0 : index
    %c2_157 = arith.constant 2 : index
    %166 = vector.load %arg10[%c0_156, %c2_157] : memref<8x326xf32, #tpu.memory_space<vmem>>, vector<8x288xf32>
    %c16_158 = arith.constant 16 : index
    %c0_159 = arith.constant 0 : index
    %167 = vector.load %arg11[%c16_158, %c0_159] : memref<72x288xf32, #tpu.memory_space<vmem>>, vector<8x288xf32>
    tpu.vector_store %arg11[%c16_158, %c0_159], %166 {strides = array<i32>} : memref<72x288xf32, #tpu.memory_space<vmem>>, vector<8x288xf32>,
    %c0_160 = arith.constant 0 : index
    %c18_161 = arith.constant 18 : index
    %168 = vector.load %arg10[%c0_160, %c18_161] : memref<8x326xf32, #tpu.memory_space<vmem>>, vector<8x288xf32>
    %c24_162 = arith.constant 24 : index
    %c0_163 = arith.constant 0 : index
    %169 = vector.load %arg11[%c24_162, %c0_163] : memref<72x288xf32, #tpu.memory_space<vmem>>, vector<8x288xf32>
    tpu.vector_store %arg11[%c24_162, %c0_163], %168 {strides = array<i32>} : memref<72x288xf32, #tpu.memory_space<vmem>>, vector<8x288xf32>,
    %c0_164 = arith.constant 0 : index
    %c19_165 = arith.constant 19 : index
    %170 = vector.load %arg10[%c0_164, %c19_165] : memref<8x326xf32, #tpu.memory_space<vmem>>, vector<8x288xf32>
    %c32_166 = arith.constant 32 : index
    %c0_167 = arith.constant 0 : index
    %171 = vector.load %arg11[%c32_166, %c0_167] : memref<72x288xf32, #tpu.memory_space<vmem>>, vector<8x288xf32>
    tpu.vector_store %arg11[%c32_166, %c0_167], %170 {strides = array<i32>} : memref<72x288xf32, #tpu.memory_space<vmem>>, vector<8x288xf32>,
    %c0_168 = arith.constant 0 : index
    %c20_169 = arith.constant 20 : index
    %172 = vector.load %arg10[%c0_168, %c20_169] : memref<8x326xf32, #tpu.memory_space<vmem>>, vector<8x288xf32>
    %c40_170 = arith.constant 40 : index
    %c0_171 = arith.constant 0 : index
    %173 = vector.load %arg11[%c40_170, %c0_171] : memref<72x288xf32, #tpu.memory_space<vmem>>, vector<8x288xf32>
    tpu.vector_store %arg11[%c40_170, %c0_171], %172 {strides = array<i32>} : memref<72x288xf32, #tpu.memory_space<vmem>>, vector<8x288xf32>,
    %c0_172 = arith.constant 0 : index
    %c36_173 = arith.constant 36 : index
    %174 = vector.load %arg10[%c0_172, %c36_173] : memref<8x326xf32, #tpu.memory_space<vmem>>, vector<8x288xf32>
    %c48_174 = arith.constant 48 : index
    %c0_175 = arith.constant 0 : index
    %175 = vector.load %arg11[%c48_174, %c0_175] : memref<72x288xf32, #tpu.memory_space<vmem>>, vector<8x288xf32>
    tpu.vector_store %arg11[%c48_174, %c0_175], %174 {strides = array<i32>} : memref<72x288xf32, #tpu.memory_space<vmem>>, vector<8x288xf32>,
    %c0_176 = arith.constant 0 : index
    %c37_177 = arith.constant 37 : index
    %176 = vector.load %arg10[%c0_176, %c37_177] : memref<8x326xf32, #tpu.memory_space<vmem>>, vector<8x288xf32>
    %c56_178 = arith.constant 56 : index
    %c0_179 = arith.constant 0 : index
    %177 = vector.load %arg11[%c56_178, %c0_179] : memref<72x288xf32, #tpu.memory_space<vmem>>, vector<8x288xf32>
    tpu.vector_store %arg11[%c56_178, %c0_179], %176 {strides = array<i32>} : memref<72x288xf32, #tpu.memory_space<vmem>>, vector<8x288xf32>,
    %c0_180 = arith.constant 0 : index
    %c38_181 = arith.constant 38 : index
    %178 = vector.load %arg10[%c0_180, %c38_181] : memref<8x326xf32, #tpu.memory_space<vmem>>, vector<8x288xf32>
    %c64_182 = arith.constant 64 : index
    %c0_183 = arith.constant 0 : index
    %179 = vector.load %arg11[%c64_182, %c0_183] : memref<72x288xf32, #tpu.memory_space<vmem>>, vector<8x288xf32>
    tpu.vector_store %arg11[%c64_182, %c0_183], %178 {strides = array<i32>} : memref<72x288xf32, #tpu.memory_space<vmem>>, vector<8x288xf32>,
    %c0_184 = arith.constant 0 : index
    %c0_185 = arith.constant 0 : index
    %180 = vector.load %arg5[%c0_184, %c0_185] : memref<8x72xf32, #tpu.memory_space<vmem>>, vector<8x72xf32>
    %c0_186 = arith.constant 0 : index
    %c0_187 = arith.constant 0 : index
    %181 = vector.load %arg11[%c0_186, %c0_187] : memref<72x288xf32, #tpu.memory_space<vmem>>, vector<72x288xf32>
    %cst_188 = arith.constant dense<0.000000e+00> : vector<8x288xf32>
    %182 = tpu.matmul %180, %181, %cst_188 {dimension_numbers = #tpu.dot_dimension_numbers<[1], [0], [0], [1], [0, 0, 1, 1], [], []>} : vector<8x72xf32>, vector<72x288xf32>, vector<8x288xf32> -> vector<8x288xf32>
    %183 = arith.mulf %182, %158 : vector<8x288xf32>
    %184 = arith.addf %183, %161 : vector<8x288xf32>
    %cst_189 = arith.constant 0.000000e+00 : f32
    %185 = vector.broadcast %cst_189 : f32 to vector<8x288xf32>
    %186 = arith.maximumf %184, %185 : vector<8x288xf32>
    %187 = vector.extract_strided_slice %186 {offsets = [0, 0], sizes = [8, 16], strides = [1, 1]} : vector<8x288xf32> to vector<8x16xf32>
    %c0_190 = arith.constant 0 : index
    %c0_191 = arith.constant 0 : index
    %c0_192 = arith.constant 0 : index
    %188 = vector.load %arg8[%c0_190, %c0_191, %c0_192] : memref<1x8x256xf32, #tpu.memory_space<vmem>>, vector<1x8x16xf32>
    %189 = vector.shape_cast %188 : vector<1x8x16xf32> to vector<8x16xf32>
    %190 = vector.shape_cast %187 : vector<8x16xf32> to vector<1x8x16xf32>
    tpu.vector_store %arg8[%c0_190, %c0_191, %c0_192], %190 {strides = array<i32>} : memref<1x8x256xf32, #tpu.memory_space<vmem>>, vector<1x8x16xf32>,
    %191 = vector.extract_strided_slice %186 {offsets = [0, 18], sizes = [8, 16], strides = [1, 1]} : vector<8x288xf32> to vector<8x16xf32>
    %c0_193 = arith.constant 0 : index
    %c0_194 = arith.constant 0 : index
    %c16_195 = arith.constant 16 : index
    %192 = vector.load %arg8[%c0_193, %c0_194, %c16_195] : memref<1x8x256xf32, #tpu.memory_space<vmem>>, vector<1x8x16xf32>
    %193 = vector.shape_cast %192 : vector<1x8x16xf32> to vector<8x16xf32>
    %194 = vector.shape_cast %191 : vector<8x16xf32> to vector<1x8x16xf32>
    tpu.vector_store %arg8[%c0_193, %c0_194, %c16_195], %194 {strides = array<i32>} : memref<1x8x256xf32, #tpu.memory_space<vmem>>, vector<1x8x16xf32>,
    %195 = vector.extract_strided_slice %186 {offsets = [0, 36], sizes = [8, 16], strides = [1, 1]} : vector<8x288xf32> to vector<8x16xf32>
    %c0_196 = arith.constant 0 : index
    %c0_197 = arith.constant 0 : index
    %c32_198 = arith.constant 32 : index
    %196 = vector.load %arg8[%c0_196, %c0_197, %c32_198] : memref<1x8x256xf32, #tpu.memory_space<vmem>>, vector<1x8x16xf32>
    %197 = vector.shape_cast %196 : vector<1x8x16xf32> to vector<8x16xf32>
    %198 = vector.shape_cast %195 : vector<8x16xf32> to vector<1x8x16xf32>
    tpu.vector_store %arg8[%c0_196, %c0_197, %c32_198], %198 {strides = array<i32>} : memref<1x8x256xf32, #tpu.memory_space<vmem>>, vector<1x8x16xf32>,
    %199 = vector.extract_strided_slice %186 {offsets = [0, 54], sizes = [8, 16], strides = [1, 1]} : vector<8x288xf32> to vector<8x16xf32>
    %c0_199 = arith.constant 0 : index
    %c0_200 = arith.constant 0 : index
    %c48_201 = arith.constant 48 : index
    %200 = vector.load %arg8[%c0_199, %c0_200, %c48_201] : memref<1x8x256xf32, #tpu.memory_space<vmem>>, vector<1x8x16xf32>
    %201 = vector.shape_cast %200 : vector<1x8x16xf32> to vector<8x16xf32>
    %202 = vector.shape_cast %199 : vector<8x16xf32> to vector<1x8x16xf32>
    tpu.vector_store %arg8[%c0_199, %c0_200, %c48_201], %202 {strides = array<i32>} : memref<1x8x256xf32, #tpu.memory_space<vmem>>, vector<1x8x16xf32>,
    %203 = vector.extract_strided_slice %186 {offsets = [0, 72], sizes = [8, 16], strides = [1, 1]} : vector<8x288xf32> to vector<8x16xf32>
    %c0_202 = arith.constant 0 : index
    %c0_203 = arith.constant 0 : index
    %c64_204 = arith.constant 64 : index
    %204 = vector.load %arg8[%c0_202, %c0_203, %c64_204] : memref<1x8x256xf32, #tpu.memory_space<vmem>>, vector<1x8x16xf32>
    %205 = vector.shape_cast %204 : vector<1x8x16xf32> to vector<8x16xf32>
    %206 = vector.shape_cast %203 : vector<8x16xf32> to vector<1x8x16xf32>
    tpu.vector_store %arg8[%c0_202, %c0_203, %c64_204], %206 {strides = array<i32>} : memref<1x8x256xf32, #tpu.memory_space<vmem>>, vector<1x8x16xf32>,
    %207 = vector.extract_strided_slice %186 {offsets = [0, 90], sizes = [8, 16], strides = [1, 1]} : vector<8x288xf32> to vector<8x16xf32>
    %c0_205 = arith.constant 0 : index
    %c0_206 = arith.constant 0 : index
    %c80_207 = arith.constant 80 : index
    %208 = vector.load %arg8[%c0_205, %c0_206, %c80_207] : memref<1x8x256xf32, #tpu.memory_space<vmem>>, vector<1x8x16xf32>
    %209 = vector.shape_cast %208 : vector<1x8x16xf32> to vector<8x16xf32>
    %210 = vector.shape_cast %207 : vector<8x16xf32> to vector<1x8x16xf32>
    tpu.vector_store %arg8[%c0_205, %c0_206, %c80_207], %210 {strides = array<i32>} : memref<1x8x256xf32, #tpu.memory_space<vmem>>, vector<1x8x16xf32>,
    %211 = vector.extract_strided_slice %186 {offsets = [0, 108], sizes = [8, 16], strides = [1, 1]} : vector<8x288xf32> to vector<8x16xf32>
    %c0_208 = arith.constant 0 : index
    %c0_209 = arith.constant 0 : index
    %c96_210 = arith.constant 96 : index
    %212 = vector.load %arg8[%c0_208, %c0_209, %c96_210] : memref<1x8x256xf32, #tpu.memory_space<vmem>>, vector<1x8x16xf32>
    %213 = vector.shape_cast %212 : vector<1x8x16xf32> to vector<8x16xf32>
    %214 = vector.shape_cast %211 : vector<8x16xf32> to vector<1x8x16xf32>
    tpu.vector_store %arg8[%c0_208, %c0_209, %c96_210], %214 {strides = array<i32>} : memref<1x8x256xf32, #tpu.memory_space<vmem>>, vector<1x8x16xf32>,
    %215 = vector.extract_strided_slice %186 {offsets = [0, 126], sizes = [8, 16], strides = [1, 1]} : vector<8x288xf32> to vector<8x16xf32>
    %c0_211 = arith.constant 0 : index
    %c0_212 = arith.constant 0 : index
    %c112_213 = arith.constant 112 : index
    %216 = vector.load %arg8[%c0_211, %c0_212, %c112_213] : memref<1x8x256xf32, #tpu.memory_space<vmem>>, vector<1x8x16xf32>
    %217 = vector.shape_cast %216 : vector<1x8x16xf32> to vector<8x16xf32>
    %218 = vector.shape_cast %215 : vector<8x16xf32> to vector<1x8x16xf32>
    tpu.vector_store %arg8[%c0_211, %c0_212, %c112_213], %218 {strides = array<i32>} : memref<1x8x256xf32, #tpu.memory_space<vmem>>, vector<1x8x16xf32>,
    %219 = vector.extract_strided_slice %186 {offsets = [0, 144], sizes = [8, 16], strides = [1, 1]} : vector<8x288xf32> to vector<8x16xf32>
    %c0_214 = arith.constant 0 : index
    %c0_215 = arith.constant 0 : index
    %c128_216 = arith.constant 128 : index
    %220 = vector.load %arg8[%c0_214, %c0_215, %c128_216] : memref<1x8x256xf32, #tpu.memory_space<vmem>>, vector<1x8x16xf32>
    %221 = vector.shape_cast %220 : vector<1x8x16xf32> to vector<8x16xf32>
    %222 = vector.shape_cast %219 : vector<8x16xf32> to vector<1x8x16xf32>
    tpu.vector_store %arg8[%c0_214, %c0_215, %c128_216], %222 {strides = array<i32>} : memref<1x8x256xf32, #tpu.memory_space<vmem>>, vector<1x8x16xf32>,
    %223 = vector.extract_strided_slice %186 {offsets = [0, 162], sizes = [8, 16], strides = [1, 1]} : vector<8x288xf32> to vector<8x16xf32>
    %c0_217 = arith.constant 0 : index
    %c0_218 = arith.constant 0 : index
    %c144_219 = arith.constant 144 : index
    %224 = vector.load %arg8[%c0_217, %c0_218, %c144_219] : memref<1x8x256xf32, #tpu.memory_space<vmem>>, vector<1x8x16xf32>
    %225 = vector.shape_cast %224 : vector<1x8x16xf32> to vector<8x16xf32>
    %226 = vector.shape_cast %223 : vector<8x16xf32> to vector<1x8x16xf32>
    tpu.vector_store %arg8[%c0_217, %c0_218, %c144_219], %226 {strides = array<i32>} : memref<1x8x256xf32, #tpu.memory_space<vmem>>, vector<1x8x16xf32>,
    %227 = vector.extract_strided_slice %186 {offsets = [0, 180], sizes = [8, 16], strides = [1, 1]} : vector<8x288xf32> to vector<8x16xf32>
    %c0_220 = arith.constant 0 : index
    %c0_221 = arith.constant 0 : index
    %c160_222 = arith.constant 160 : index
    %228 = vector.load %arg8[%c0_220, %c0_221, %c160_222] : memref<1x8x256xf32, #tpu.memory_space<vmem>>, vector<1x8x16xf32>
    %229 = vector.shape_cast %228 : vector<1x8x16xf32> to vector<8x16xf32>
    %230 = vector.shape_cast %227 : vector<8x16xf32> to vector<1x8x16xf32>
    tpu.vector_store %arg8[%c0_220, %c0_221, %c160_222], %230 {strides = array<i32>} : memref<1x8x256xf32, #tpu.memory_space<vmem>>, vector<1x8x16xf32>,
    %231 = vector.extract_strided_slice %186 {offsets = [0, 198], sizes = [8, 16], strides = [1, 1]} : vector<8x288xf32> to vector<8x16xf32>
    %c0_223 = arith.constant 0 : index
    %c0_224 = arith.constant 0 : index
    %c176_225 = arith.constant 176 : index
    %232 = vector.load %arg8[%c0_223, %c0_224, %c176_225] : memref<1x8x256xf32, #tpu.memory_space<vmem>>, vector<1x8x16xf32>
    %233 = vector.shape_cast %232 : vector<1x8x16xf32> to vector<8x16xf32>
    %234 = vector.shape_cast %231 : vector<8x16xf32> to vector<1x8x16xf32>
    tpu.vector_store %arg8[%c0_223, %c0_224, %c176_225], %234 {strides = array<i32>} : memref<1x8x256xf32, #tpu.memory_space<vmem>>, vector<1x8x16xf32>,
    %235 = vector.extract_strided_slice %186 {offsets = [0, 216], sizes = [8, 16], strides = [1, 1]} : vector<8x288xf32> to vector<8x16xf32>
    %c0_226 = arith.constant 0 : index
    %c0_227 = arith.constant 0 : index
    %c192_228 = arith.constant 192 : index
    %236 = vector.load %arg8[%c0_226, %c0_227, %c192_228] : memref<1x8x256xf32, #tpu.memory_space<vmem>>, vector<1x8x16xf32>
    %237 = vector.shape_cast %236 : vector<1x8x16xf32> to vector<8x16xf32>
    %238 = vector.shape_cast %235 : vector<8x16xf32> to vector<1x8x16xf32>
    tpu.vector_store %arg8[%c0_226, %c0_227, %c192_228], %238 {strides = array<i32>} : memref<1x8x256xf32, #tpu.memory_space<vmem>>, vector<1x8x16xf32>,
    %239 = vector.extract_strided_slice %186 {offsets = [0, 234], sizes = [8, 16], strides = [1, 1]} : vector<8x288xf32> to vector<8x16xf32>
    %c0_229 = arith.constant 0 : index
    %c0_230 = arith.constant 0 : index
    %c208_231 = arith.constant 208 : index
    %240 = vector.load %arg8[%c0_229, %c0_230, %c208_231] : memref<1x8x256xf32, #tpu.memory_space<vmem>>, vector<1x8x16xf32>
    %241 = vector.shape_cast %240 : vector<1x8x16xf32> to vector<8x16xf32>
    %242 = vector.shape_cast %239 : vector<8x16xf32> to vector<1x8x16xf32>
    tpu.vector_store %arg8[%c0_229, %c0_230, %c208_231], %242 {strides = array<i32>} : memref<1x8x256xf32, #tpu.memory_space<vmem>>, vector<1x8x16xf32>,
    %243 = vector.extract_strided_slice %186 {offsets = [0, 252], sizes = [8, 16], strides = [1, 1]} : vector<8x288xf32> to vector<8x16xf32>
    %c0_232 = arith.constant 0 : index
    %c0_233 = arith.constant 0 : index
    %c224_234 = arith.constant 224 : index
    %244 = vector.load %arg8[%c0_232, %c0_233, %c224_234] : memref<1x8x256xf32, #tpu.memory_space<vmem>>, vector<1x8x16xf32>
    %245 = vector.shape_cast %244 : vector<1x8x16xf32> to vector<8x16xf32>
    %246 = vector.shape_cast %243 : vector<8x16xf32> to vector<1x8x16xf32>
    tpu.vector_store %arg8[%c0_232, %c0_233, %c224_234], %246 {strides = array<i32>} : memref<1x8x256xf32, #tpu.memory_space<vmem>>, vector<1x8x16xf32>,
    %247 = vector.extract_strided_slice %186 {offsets = [0, 270], sizes = [8, 16], strides = [1, 1]} : vector<8x288xf32> to vector<8x16xf32>
    %c0_235 = arith.constant 0 : index
    %c0_236 = arith.constant 0 : index
    %c240_237 = arith.constant 240 : index
    %248 = vector.load %arg8[%c0_235, %c0_236, %c240_237] : memref<1x8x256xf32, #tpu.memory_space<vmem>>, vector<1x8x16xf32>
    %249 = vector.shape_cast %248 : vector<1x8x16xf32> to vector<8x16xf32>
    %250 = vector.shape_cast %247 : vector<8x16xf32> to vector<1x8x16xf32>
    tpu.vector_store %arg8[%c0_235, %c0_236, %c240_237], %250 {strides = array<i32>} : memref<1x8x256xf32, #tpu.memory_space<vmem>>, vector<1x8x16xf32>,
    return
  }
  func.func @transform_0(%arg0: i32) -> (i32, i32, i32) {
    %c0_i32 = arith.constant 0 : i32
    %c0_i32_0 = arith.constant 0 : i32
    %c0_i32_1 = arith.constant 0 : i32
    return %arg0, %c0_i32, %c0_i32_0 : i32, i32, i32
  }
  func.func @transform_1(%arg0: i32) -> (i32, i32) {
    %c0_i32 = arith.constant 0 : i32
    %c0_i32_0 = arith.constant 0 : i32
    %c0_i32_1 = arith.constant 0 : i32
    return %c0_i32, %c0_i32_0 : i32, i32
  }
  func.func @transform_2(%arg0: i32) -> (i32, i32) {
    %c0_i32 = arith.constant 0 : i32
    %c0_i32_0 = arith.constant 0 : i32
    %c0_i32_1 = arith.constant 0 : i32
    return %c0_i32, %c0_i32_0 : i32, i32
  }
  func.func @transform_3(%arg0: i32) -> (i32, i32) {
    %c0_i32 = arith.constant 0 : i32
    %c0_i32_0 = arith.constant 0 : i32
    %c0_i32_1 = arith.constant 0 : i32
    return %c0_i32, %c0_i32_0 : i32, i32
  }
  func.func @transform_4(%arg0: i32) -> (i32, i32) {
    %c0_i32 = arith.constant 0 : i32
    %c0_i32_0 = arith.constant 0 : i32
    %c0_i32_1 = arith.constant 0 : i32
    return %c0_i32, %c0_i32_0 : i32, i32
  }
  func.func @transform_5(%arg0: i32) -> (i32, i32) {
    %c0_i32 = arith.constant 0 : i32
    %c0_i32_0 = arith.constant 0 : i32
    %c0_i32_1 = arith.constant 0 : i32
    return %c0_i32, %c0_i32_0 : i32, i32
  }
  func.func @transform_6(%arg0: i32) -> (i32, i32) {
    %c0_i32 = arith.constant 0 : i32
    %c0_i32_0 = arith.constant 0 : i32
    %c0_i32_1 = arith.constant 0 : i32
    return %c0_i32, %c0_i32_0 : i32, i32
  }
  func.func @transform_7(%arg0: i32) -> (i32, i32, i32) {
    %c0_i32 = arith.constant 0 : i32
    %c0_i32_0 = arith.constant 0 : i32
    %c0_i32_1 = arith.constant 0 : i32
    return %arg0, %c0_i32, %c0_i32_0 : i32, i32, i32
  }
}

</mosaic_0001>

<bundles_post_ra>
// kernel: _forward_impl.1
= control target key start
LH: loop header
LB: loop body
LE: loop exit
PB: predicated region body
PF: predicated region fallthrough
CT: control target
= control target key end

     0   :  { %s1642_s24 = smov 0   ;;  %s2037_s0 = inlined_call_operand.vmem [shape: f32[2,4,256], index: 0, kind: input, shape index: {}]   ;;  %s2038_s1 = inlined_call_operand.vmem [shape: f32[8,72], index: 1, kind: input, shape index: {}]   ;;  %s2039_s2 = inlined_call_operand.vmem [shape: f32[8,1], index: 2, kind: input, shape index: {}]   ;;  %s2040_s3 = inlined_call_operand.vmem [shape: f32[8,1], index: 3, kind: input, shape index: {}]   ;;  %s2041_s4 = inlined_call_operand.vmem [shape: f32[8,72], index: 4, kind: input, shape index: {}]   ;;  %s2042_s5 = inlined_call_operand.vmem [shape: f32[8,1], index: 5, kind: input, shape index: {}]   ;;  %s2043_s6 = inlined_call_operand.vmem [shape: f32[8,1], index: 6, kind: input, shape index: {}]   ;;  %s2044_s7 = inlined_call_operand.vmem [shape: f32[2,8,256], index: 7, kind: output, shape index: {}]  }
   0x1 LB: > { %s1484_s25 = sadd.s32 4294967295, %s1560_s24   ;;  %p1488_p0 = scmp.ge.s32.totalorder %s1560_s24, 1  ;;  %s1560_s24 = sphi %s1642_s24, %s17_s24  }
   0x2   : > { %p237_p1 = scmp.lt.s32.totalorder %s1560_s24, 3 }
   0x4   : > { %p238_p2 = pnand %p1488_p0, %p237_p1 }
   0x5   : > { %p269_p3 = scmp.lt.s32.totalorder (!%p238_p2), %s1484_s25, 1  ;;  %s1562_s30 = smov (!%p238_p2), 19  }
   0x6   : > { %241 = sbr.rel (%p238_p2) target bundleno = 1872 (0x750), region = 48  ;;  %s1563_s8 = smov (!%p238_p2), 23  }
   0x7   : > { %s1564_s9 = smov (!%p238_p2), 31   ;;  %s1565_s10 = smov (!%p238_p2), 21  }
   0x8   : > { %s1566_s11 = smov (!%p238_p2), 25   ;;  %s1567_s12 = smov (!%p238_p2), 27  }
   0x9   : > { %s1568_s13 = smov (!%p238_p2), 29   ;;  %s1569_s14 = smov (!%p238_p2), 33  }
   0xa   : > { %s1570_s15 = smov (!%p238_p2), 35   ;;  %s1571_s16 = smov (!%p238_p2), 37  }
   0xb   : > { %s2059_s25 = smov (!%p269_p3, %s1484_s25), 1  ;;  %s1572_s17 = smov 39   ;;  %vm284_vm0 = vcmask 281752   ;;  %vm291_vm1 = vcmask 429352   ;;  %vm298_vm2 = vcmask 576952   ;;  %vm305_vm3 = vcmask 724552  }
   0xc   : > { %s1501_s26 = sshll.u32 %s2059_s25, 3  ;;  %s1573_s18 = smov 45   ;;  %vm312_vm4 = vcmask 872152   ;;  %vm329_vm5 = vcmask 1044472   ;;  %vm330_vm6 = vcmask 121860   ;;  %vm326_vm7 = vcmask 252928  }
   0xd   : > { %s1656_s29 = scalar_lea.vmem %s2037_s0, %s1501_s26  ;;  %s1574_s19 = smov 41   ;;  %vm319_vm8 = vcmask 1019752   ;;  %vm331_vm9 = vmor %vm330_vm6, %vm329_vm5  ;;  %vm338_vm10 = vcmask 265352   ;;  %vm345_vm11 = vcmask 412952   ;;  %vm352_vm12 = vcmask 560552  }
   0xe   : > { %v279_v0 = vld [vmem:[%s1656_s29] sm:$0xf]  ;;  %v340_v8 = vld [vmem:[%s1656_s29 + $0x4] sm:$0xf]  ;;  %s1575_s20 = smov 43   ;;  %s1576_s21 = smov 47   ;;  %v401_v47 = vlaneseq }
   0xf   : > { %v293_v1 = vld [vmem:[%s1656_s29] sm:$0xf]  ;;  %281 = vrot.lane.b32.xlu0 %v279_v0, %s1562_s30  ;;  %v347_v9 = vld [vmem:[%s1656_s29 + $0x4] sm:$0xf]  ;;  %s1577_s22 = smov 49   ;;  %vm359_vm13 = vcmask 708152  }
  0x10   : > { %295 = vrot.lane.b32.xlu1 %v293_v1, %s1563_s8  ;;  %v321_v2 = vld [vmem:[%s1656_s29] sm:$0xf]  ;;  %v354_v10 = vld [vmem:[%s1656_s29 + $0x4] sm:$0xf]  ;;  %vm383_vm14 = vcmask 1044456   ;;  %vm384_vm15 = vcmask 105476  }
  0x11   : > { %323 = vrot.lane.b32.xlu2 %v321_v2, %s1564_s9  ;;  %v286_v3 = vld [vmem:[%s1656_s29] sm:$0xf]  ;;  %v375_v11 = vld [vmem:[%s1656_s29 + $0x4] sm:$0xf]  ;;  %vm399_vm5 = vcmask 396552   ;;  %s1578_s23 = smov 112  }
  0x12   : > { %v300_v4 = vld [vmem:[%s1656_s29] sm:$0xf]  ;;  %v361_v12 = vld [vmem:[%s1656_s29 + $0x4] sm:$0xf]  ;;  %s1579_s26 = smov 110   ;;  %s1580_s27 = smov 108  }
  0x13   : > { %v307_v5 = vld [vmem:[%s1656_s29] sm:$0xf]  ;;  %v368_v13 = vld [vmem:[%s1656_s29 + $0x4] sm:$0xf]  ;;  %v1684_v48 = vand.u32 127, %v401_v47  ;;  %v1581_v52 = vmov 0  }
  0x14   : > { %v314_v6 = vld [vmem:[%s1656_s29] sm:$0xf]  ;;  %v387_v14 = vld [vmem:[%s1656_s29 + $0x4] sm:$0xf]  ;;  %1552 = vset.pattern.permute.xlu0 %v1581_v52  ;;  %1551 = vset.pattern.permute.xlu2 %v1581_v52  ;;  %s1582_s28 = smov 18   ;;  %s1585_s8 = smov 36  }
  0x15   : > { %v333_v7 = vld [vmem:[%s1656_s29] sm:$0xf]  ;;  %v394_v15 = vld [vmem:[%s1656_s29 + $0x4] sm:$0xf]  ;;  %v1687_v49 = vadd.s32 256, %v1684_v48  ;;  %v1690_v50 = vadd.s32 128, %v1684_v48  ;;  %1553 = vset.pattern.permute.xlu1 %v1581_v52 }
  0x16   : > { %v408_v61 = vand.u32 65535, %v1684_v48  ;;  %s1584_s29 = smov 92   ;;  %s1586_s9 = smov 126  }
  0x17   : > { %288 = vrot.lane.b32.xlu0 %v286_v3, %s1565_s10  ;;  %v466_v51 = vand.u32 65535, %v1687_v49  ;;  %v437_v53 = vand.u32 65535, %v1690_v50  ;;  %v467_v54 = vshrl.u32 %v1687_v49, 16  ;;  %v438_v56 = vshrl.u32 %v1690_v50, 16  ;;  %s1587_s10 = smov 109  }
  0x18   : > { %302 = vrot.lane.b32.xlu1 %v300_v4, %s1566_s11  ;;  %v409_v3 = vshrl.u32 %v1684_v48, 16  ;;  %v412_v4 = vmul.u32 58254, %v408_v61  ;;  %s1588_s11 = smov 91  }
  0x19   : > { %309 = vrot.lane.b32.xlu2 %v307_v5, %s1567_s12  ;;  %v470_v55 = vmul.u32 58254, %v466_v51  ;;  %v441_v57 = vmul.u32 58254, %v437_v53  ;;  %v469_v58 = vmul.u32 14564, %v466_v51  ;;  %v471_v59 = vmul.u32 14564, %v467_v54  ;;  %s1589_s12 = smov 90  }
  0x1a   : > { %v440_v62 = vmul.u32 14564, %v437_v53  ;;  %v442_v63 = vmul.u32 14564, %v438_v56  ;;  %v472_v5 = vmul.u32 58254, %v467_v54 }
  0x1b   : > { %v473_v60 = vshll.u32 %v470_v55, 16  ;;  %v444_v0 = vshll.u32 %v441_v57, 16  ;;  %v475_v1 = vshll.u32 %v471_v59, 16 }
  0x1d   : > { %vm477_vm6 = vc.u32 %v469_v58, %v473_v60  ;;  %v479_v2 = vadd.s32 %v473_v60, %v469_v58 }
  0x1f   : > { %316 = vrot.lane.b32.xlu0 %v314_v6, %s1568_s13  ;;  %v478_v6 = vsel %vm477_vm6, 1, %v1581_v52  ;;  %s1590_s13 = smov 127  }
  0x20   : > { %335 = vrot.lane.b32.xlu1 %v333_v7, %s1569_s14  ;;  %v446_v7 = vshll.u32 %v442_v63, 16  ;;  %s1592_s14 = smov 124  }
  0x21   : > { %342 = vrot.lane.b32.xlu2 %v340_v8, %s1570_s15  ;;  %v450_v8 = vadd.s32 %v444_v0, %v440_v62  ;;  %s1593_s15 = smov 120  }
  0x27   : > { %349 = vrot.lane.b32.xlu0 %v347_v9, %s1571_s16  ;;  %v411_v9 = vmul.u32 14564, %v408_v61  ;;  %s1595_s16 = smov 116  }
  0x28   : > { %356 = vrot.lane.b32.xlu1 %v354_v10, %s1572_s17  ;;  %v413_v10 = vmul.u32 14564, %v409_v3  ;;  %s1596_s17 = smov 100  }
  0x29   : > { %377 = vrot.lane.b32.xlu2 %v375_v11, %s1573_s18  ;;  %v415_v11 = vshll.u32 %v412_v4, 16  ;;  %s1598_s18 = smov 104  }
  0x2f   : > { %363 = vrot.lane.b32.xlu0 %v361_v12, %s1574_s19  ;;  %v480_v12 = vadd.s32 %v478_v6, %v472_v5  ;;  %s1599_s19 = smov 98  }
  0x30   : > { %370 = vrot.lane.b32.xlu1 %v368_v13, %s1575_s20  ;;  %v443_v13 = vmul.u32 58254, %v438_v56 }
  0x31   : > { %389 = vrot.lane.b32.xlu2 %v387_v14, %s1576_s21 }
  0x37   : > { %396 = vrot.lane.b32.xlu0 %v394_v15, %s1577_s22 }
  0x6b   : > { %v324_v16 = vpop.permute.xlu2 %323 }
  0x6c   : > { %v325_v22 = vrot.slane %v324_v16, 4 }
  0x6e   : > { %v327_v26 = vsel %vm326_vm7, %v325_v22, %v324_v16  ;;  %vm448_vm7 = vc.u32 %v440_v62, %v444_v0  ;;  %v417_v16 = vshll.u32 %v413_v10, 16 }
  0x6f   : > { %v449_v15 = vsel %vm448_vm7, 1, %v1581_v52  ;;  %vm568_vm7 = vcmask 883712  }
  0x73   : > { %v310_v19 = vpop.permute.xlu2 %309 }
  0x7b   : > { %v343_v23 = vpop.permute.xlu2 %342 }
  0x81   : > { %v282_v17 = vpop.permute.xlu0 %281 }
  0x82   : > { %v296_v18 = vpop.permute.xlu1 %295  ;;  %285 = vst.msk [vmem:[#allocation2] sm:$0xf] %vm284_vm0, %v282_v17  ;;  %vm366_vm0 = vcmask 855752   ;;  %v421_v17 = vadd.s32 %v415_v11, %v411_v9 }
  0x83   : > { %v378_v29 = vpop.permute.xlu2 %377 }
  0x84   : > { %v379_v30 = vrot.slane %v378_v29, 4 }
  0x89   : > { %v289_v20 = vpop.permute.xlu0 %288 }
  0x8a   : > { %v303_v21 = vpop.permute.xlu1 %302  ;;  %292 = vst.msk [vmem:[#allocation2] sm:$0xf] %vm291_vm1, %v289_v20  ;;  %vm380_vm1 = vcmask 367616   ;;  %v451_v20 = vadd.s32 %v449_v15, %v443_v13  ;;  %v1583_v13 = vmov 0.0  }
  0x8b   : > { %299 = vst.msk [vmem:[#allocation2] sm:$0xf] %vm298_vm2, %v296_v18  ;;  %vm373_vm2 = vcmask 1003352   ;;  %v390_v33 = vpop.permute.xlu2 %389  ;;  %v381_v34 = vsel %vm380_vm1, %v379_v30, %v378_v29  ;;  %v474_v18 = vshrl.u32 %v470_v55, 16 }
  0x8c   : > { %306 = vst.msk [vmem:[#allocation2] sm:$0xf] %vm305_vm3, %v303_v21  ;;  %vm385_vm3 = vmor %vm384_vm15, %vm383_vm14  ;;  %v414_v21 = vmul.u32 58254, %v409_v3 }
  0x8d   : > { %313 = vst.msk [vmem:[#allocation2] sm:$0xf] %vm312_vm4, %v310_v19  ;;  %vm392_vm4 = vcmask 248952  }
  0x8e   : > { %615 = vst [vmem:[#allocation4] sm:$0xf0] %v1583_v13 }
  0x8f   : > { %616 = vst [vmem:[#allocation4 + $0x8] sm:$0xf0] %v1583_v13 }
  0x90   : > { %619 = vst [vmem:[#allocation4 + $0x18] sm:$0xf0] %v1583_v13 }
  0x91   : > { %v317_v24 = vpop.permute.xlu0 %316  ;;  %620 = vst [vmem:[#allocation4 + $0x20] sm:$0xf0] %v1583_v13 }
  0x92   : > { %v336_v25 = vpop.permute.xlu1 %335  ;;  %320 = vst.msk [vmem:[#allocation2] sm:$0xf] %vm319_vm8, %v317_v24  ;;  %vm481_vm8 = vc.u32 %v479_v2, %v475_v1  ;;  %v476_v24 = vshrl.u32 %v471_v59, 16 }
  0x93   : > { %332 = vst.msk [vmem:[#allocation2] sm:$0xff] %vm331_vm9, %v327_v26  ;;  %v482_v14 = vsel %vm481_vm8, 1, %v1581_v52  ;;  %vm452_vm9 = vc.u32 %v450_v8, %v446_v7  ;;  %v445_v26 = vshrl.u32 %v441_v57, 16  ;;  %vm529_vm8 = vcmask 916480  }
  0x94   : > { %339 = vst.msk [vmem:[#allocation2 + $0x4] sm:$0xf] %vm338_vm10, %v336_v25  ;;  %vm419_vm10 = vc.u32 %v411_v9, %v415_v11  ;;  %v484_v19 = vadd.s32 %v482_v14, %v480_v12  ;;  %v453_v22 = vsel %vm452_vm9, 1, %v1581_v52  ;;  %vm547_vm9 = vcmask 900096  }
  0x95   : > { %346 = vst.msk [vmem:[#allocation2 + $0x4] sm:$0xf] %vm345_vm11, %v343_v23  ;;  %v420_v23 = vsel %vm419_vm10, 1, %v1581_v52  ;;  %vm423_vm11 = vc.u32 %v421_v17, %v417_v16 }
  0x96   : > { %v485_v25 = vadd.s32 %v484_v19, %v474_v18  ;;  %v424_v29 = vsel %vm423_vm11, 1, %v1581_v52  ;;  %622 = vst [vmem:[#allocation4 + $0x30] sm:$0xf0] %v1583_v13 }
  0x97   : > { %623 = vst [vmem:[#allocation4 + $0x38] sm:$0xf0] %v1583_v13 }
  0x98   : > { %v486_v30 = vadd.s32 %v485_v25, %v476_v24  ;;  %625 = vst [vmem:[#allocation4 + $0x48] sm:$0xf0] %v1583_v13 }
  0x99   : > { %v350_v27 = vpop.permute.xlu0 %349  ;;  %626 = vst [vmem:[#allocation4 + $0x50] sm:$0xf0] %v1583_v13 }
  0x9a   : > { %v357_v28 = vpop.permute.xlu1 %356  ;;  %353 = vst.msk [vmem:[#allocation2 + $0x4] sm:$0xf] %vm352_vm12, %v350_v27  ;;  %v455_v27 = vadd.s32 %v453_v22, %v451_v20 }
  0x9b   : > { %360 = vst.msk [vmem:[#allocation2 + $0x4] sm:$0xf] %vm359_vm13, %v357_v28  ;;  %v422_v28 = vadd.s32 %v420_v23, %v414_v21 }
  0x9c   : > { %628 = vst [vmem:[#allocation4 + $0x60] sm:$0xf0] %v1583_v13 }
  0x9d   : > { %629 = vst [vmem:[#allocation4 + $0x68] sm:$0xf0] %v1583_v13 }
  0x9e   : > { %631 = vst [vmem:[#allocation4 + $0x78] sm:$0xf0] %v1583_v13 }
  0x9f   : > { %632 = vst [vmem:[#allocation4 + $0x80] sm:$0xf0] %v1583_v13 }
  0xa0   : > { %634 = vst [vmem:[#allocation4 + $0x90] sm:$0xf0] %v1583_v13 }
  0xa1   : > { %v364_v31 = vpop.permute.xlu0 %363  ;;  %635 = vst [vmem:[#allocation4 + $0x98] sm:$0xf0] %v1583_v13 }
  0xa2   : > { %v371_v32 = vpop.permute.xlu1 %370  ;;  %367 = vst.msk [vmem:[#allocation2 + $0x4] sm:$0xf] %vm366_vm0, %v364_v31  ;;  %v447_v31 = vshrl.u32 %v442_v63, 16 }
  0xa3   : > { %374 = vst.msk [vmem:[#allocation2 + $0x4] sm:$0xf] %vm373_vm2, %v371_v32  ;;  %v456_v32 = vadd.s32 %v455_v27, %v445_v26 }
  0xa4   : > { %386 = vst.msk [vmem:[#allocation2 + $0x4] sm:$0xff] %vm385_vm3, %v381_v34  ;;  %v426_v34 = vadd.s32 %v424_v29, %v422_v28 }
  0xa5   : > { %393 = vst.msk [vmem:[#allocation2 + $0x8] sm:$0xf] %vm392_vm4, %v390_v33  ;;  %v416_v33 = vshrl.u32 %v412_v4, 16 }
  0xa6   : > { %637 = vst [vmem:[#allocation4 + $0xa8] sm:$0xf0] %v1583_v13 }
  0xa7   : > { %638 = vst [vmem:[#allocation4 + $0xb0] sm:$0xf0] %v1583_v13 }
  0xa8   : > { %640 = vst [vmem:[#allocation4 + $0xc0] sm:$0xf0] %v1583_v13 }
  0xa9   : > { %v397_v35 = vpop.permute.xlu0 %396  ;;  %641 = vst [vmem:[#allocation4 + $0xc8] sm:$0xf0] %v1583_v13 }
  0xaa   : > { %400 = vst.msk [vmem:[#allocation2 + $0x8] sm:$0xf] %vm399_vm5, %v397_v35  ;;  %v487_v35 = vshrl.u32 %v486_v30, 4 }
  0xab   : > { %v513_v36 = vld [vmem:[#allocation2] sm:$0xff] }
  0xac   : > { %517 = vst [vmem:[#allocation1] ss:$2 sm:$0xff] %v513_v36 }
  0xb1   : > { %v514_v37 = vld [vmem:[#allocation2 + $0x8] sm:$0xf] }
  0xb2   : > { %519 = vst [vmem:[#allocation1 + $0x10] ss:$2 sm:$0xff] %v514_v37 }
  0xb3   : > { %v520_v38 = vld.sshfl [vmem:[#allocation1] sm:$0xff pattern:$0x75316420]  ;;  %v521_v39 = vld.sshfl [vmem:[#allocation1 + $0x8] sm:$0xff pattern:$0x75316420] }
  0xb4   : > { %525 = vrot.lane.b32.xlu1 %v521_v39, %s1578_s23  ;;  %535 = vst [vmem:[#allocation1] ss:$2 sm:$0xff] %v513_v36  ;;  %v488_v39 = vmul.u32 18, %v487_v35 }
  0xb9   : > { %v522_v40 = vld.sshfl [vmem:[#allocation1 + $0x10] sm:$0xff pattern:$0x75316420] }
  0xba   : > { %527 = vrot.lane.b32.xlu2 %v522_v40, %s1578_s23  ;;  %537 = vst [vmem:[#allocation1 + $0x10] ss:$2 sm:$0xff] %v514_v37 }
  0xbb   : > { %v539_v41 = vld.sshfl [vmem:[#allocation1 + $0x8] sm:$0xff pattern:$0x75316420]  ;;  %v538_v42 = vld.sshfl [vmem:[#allocation1] sm:$0xff pattern:$0x75316420] }
  0xbc   : > { %543 = vrot.lane.b32.xlu0 %v539_v41, %s1579_s26  ;;  %556 = vst [vmem:[#allocation1] ss:$2 sm:$0xff] %v513_v36  ;;  %v457_v36 = vadd.s32 %v456_v32, %v447_v31 }
  0xbe   : > { %v458_v40 = vshrl.u32 %v457_v36, 4 }
  0xc1   : > { %v540_v43 = vld.sshfl [vmem:[#allocation1 + $0x10] sm:$0xff pattern:$0x75316420] }
  0xc2   : > { %545 = vrot.lane.b32.xlu1 %v540_v43, %s1579_s26  ;;  %558 = vst [vmem:[#allocation1 + $0x10] ss:$2 sm:$0xff] %v514_v37  ;;  %v418_v37 = vshrl.u32 %v413_v10, 16 }
  0xc3   : > { %v560_v44 = vld.sshfl [vmem:[#allocation1 + $0x8] sm:$0xff pattern:$0x75316420]  ;;  %v559_v46 = vld.sshfl [vmem:[#allocation1] sm:$0xff pattern:$0x75316420] }
  0xc4   : > { %564 = vrot.lane.b32.xlu2 %v560_v44, %s1580_s27  ;;  %v459_v44 = vmul.u32 18, %v458_v40 }
  0xc6   : > { %v460_v47 = vsub.s32 %v1690_v50, %v459_v44 }
  0xc8   : > { %vm493_vm15 = vcmp.ne.s32.totalorder %v460_v47, 0  ;;  %vm496_vm0 = vcmp.lt.s32.totalorder %v460_v47, 0 }
  0xc9   : > { %v561_v45 = vld.sshfl [vmem:[#allocation1 + $0x10] sm:$0xff pattern:$0x75316420]  ;;  %vm499_vm1 = vmand %vm496_vm0, %vm493_vm15  ;;  %vm593_vm15 = vcmask 1043600   ;;  %vm594_vm0 = vcmask 1047556  }
  0xca   : > { %523 = vrot.lane.b32.xlu1 %v520_v38, %s1578_s23  ;;  %566 = vrot.lane.b32.xlu0 %v561_v45, %s1580_s27  ;;  %v427_v38 = vadd.s32 %v426_v34, %v416_v33 }
  0xcc   : > { %541 = vrot.lane.b32.xlu2 %v538_v42, %s1579_s26  ;;  %v428_v41 = vadd.s32 %v427_v38, %v418_v37  ;;  %v489_v42 = vsub.s32 %v1687_v49, %v488_v39  ;;  %v502_v49 = vadd.s32 18, %v460_v47 }
  0xce   : > { %v429_v45 = vshrl.u32 %v428_v41, 4  ;;  %vm494_vm12 = vcmp.ne.s32.totalorder %v489_v42, 0  ;;  %vm497_vm13 = vcmp.lt.s32.totalorder %v489_v42, 0  ;;  %v503_v52 = vadd.s32 18, %v489_v42 }
  0xcf   : > { %vm500_vm14 = vmand %vm497_vm13, %vm494_vm12  ;;  %v1705_v50 = vsel %vm499_vm1, %v502_v49, %v460_v47  ;;  %vm588_vm1 = vcmask 146432  }
  0xd0   : > { %v430_v51 = vmul.u32 18, %v429_v45  ;;  %v1701_v56 = vsel %vm500_vm14, %v503_v52, %v489_v42  ;;  %vm511_vm10 = vcmp.eq.s32.totalorder %v1705_v50, 17  ;;  %vm508_vm11 = vcmp.eq.s32.totalorder %v1705_v50, 0 }
  0xd1   : > { %vm512_vm2 = vcmp.eq.s32.totalorder %v1701_v56, 17  ;;  %vm509_vm5 = vcmp.eq.s32.totalorder %v1701_v56, 0  ;;  %vm581_vm14 = vcmask 1043456  }
  0xd2   : > { %562 = vrot.lane.b32.xlu0 %v559_v46, %s1580_s27  ;;  %v431_v55 = vsub.s32 %v1684_v48, %v430_v51 }
  0xd4   : > { %vm492_vm3 = vcmp.ne.s32.totalorder %v431_v55, 0  ;;  %vm495_vm4 = vcmp.lt.s32.totalorder %v431_v55, 0  ;;  %v501_v58 = vadd.s32 18, %v431_v55 }
  0xd5   : > { %vm498_vm6 = vmand %vm495_vm4, %vm492_vm3  ;;  %vm597_vm4 = vcmask 404480  }
  0xd6   : > { %v1714_v62 = vsel %vm498_vm6, %v501_v58, %v431_v55  ;;  %vm595_vm3 = vmor %vm594_vm0, %vm593_vm15  ;;  %vm604_vm6 = vcmask 142336   ;;  %vm613_vm15 = vcmask 568864   ;;  %vm670_vm0 = vcmask 257024  }
  0xd7   : > { %vm510_vm12 = vcmp.eq.s32.totalorder %v1714_v62, 17  ;;  %vm507_vm13 = vcmp.eq.s32.totalorder %v1714_v62, 0 }
 0x114   : > { %v528_v46 = vpop.permute.xlu2 %527 }
 0x11e   : > { %v565_v57 = vpop.permute.xlu2 %564 }
 0x126   : > { %v526_v43 = vpop.permute.xlu1 %525  ;;  %v542_v5 = vpop.permute.xlu2 %541 }
 0x127   : > { %v531_v1 = vsel %vm529_vm8, %v526_v43, %v528_v46 }
 0x12e   : > { %v544_v53 = vpop.permute.xlu0 %543 }
 0x12f   : > { %v548_v6 = vsel %vm547_vm9, %v542_v5, %v544_v53 }
 0x134   : > { %v546_v54 = vpop.permute.xlu1 %545 }
 0x135   : > { %v555_v59 = vsel %vm512_vm2, %v528_v46, %v546_v54  ;;  %v549_v61 = vsel %vm547_vm9, %v544_v53, %v546_v54 }
 0x136   : > { %v554_v2 = vsel %vm511_vm10, %v531_v1, %v549_v61 }
 0x13c   : > { %v567_v48 = vpop.permute.xlu0 %566  ;;  %v524_v63 = vpop.permute.xlu1 %523 }
 0x13d   : > { %v576_v60 = vsel %vm509_vm5, %v567_v48, %v555_v59  ;;  %v570_v0 = vsel %vm568_vm7, %v565_v57, %v567_v48  ;;  %v530_v3 = vsel %vm529_vm8, %v524_v63, %v526_v43 }
 0x13e   : > { %585 = vrot.lane.b32.xlu2 %v576_v60, %s1582_s28  ;;  %v575_v4 = vsel %vm508_vm11, %v570_v0, %v554_v2  ;;  %v553_v8 = vsel %vm510_vm12, %v530_v3, %v548_v6 }
 0x13f   : > { %v580_v9 = vrot.slane %v575_v4, 4 }
 0x144   : > { %v563_v7 = vpop.permute.xlu0 %562 }
 0x145   : > { %v569_v10 = vsel %vm568_vm7, %v563_v7, %v565_v57 }
 0x146   : > { %v574_v11 = vsel %vm507_vm13, %v569_v10, %v553_v8 }
 0x147   : > { %v582_v12 = vsel %vm581_vm14, %v574_v11, %v580_v9  ;;  %vm611_vm14 = vcmask 552336  }
 0x148   : > { %583 = vrot.lane.b32.xlu1 %v582_v12, %s1582_s28 }
 0x198   : > { %v586_v16 = vpop.permute.xlu2 %585 }
 0x1ba   : > { %v584_v14 = vpop.permute.xlu1 %583 }
 0x1bb   : > { %v587_v15 = vrot.slane %v584_v14, 4 }
 0x1bd   : > { %v589_v17 = vsel %vm588_vm1, %v587_v15, %v584_v14  ;;  %v590_v18 = vsel %vm588_vm1, %v587_v15, %v586_v16 }
 0x1be   : > { %596 = vst.msk [vmem:[#allocation2] sm:$0xff] %vm595_vm3, %v589_v17  ;;  %vm617_vm3 = vcmask 261124  }
 0x1bf   : > { %598 = vst.msk [vmem:[#allocation2 + $0x8] sm:$0xf] %vm597_vm4, %v590_v18  ;;  %vm762_vm4 = vcmask 891904  }
 0x1c0   : > { %642 = vst.msk [vmem:[#allocation4 + $0xd0] sm:$0xf0] %vm617_vm3, %v1583_v13 }
 0x1c1   : > { %618 = vst.msk [vmem:[#allocation4 + $0x10] sm:$0xf0] %vm617_vm3, %v1583_v13 }
 0x1c2   : > { %621 = vst.msk [vmem:[#allocation4 + $0x28] sm:$0xf0] %vm617_vm3, %v1583_v13 }
 0x1c3   : > { %624 = vst.msk [vmem:[#allocation4 + $0x40] sm:$0xf0] %vm617_vm3, %v1583_v13 }
 0x1c4   : > { %627 = vst.msk [vmem:[#allocation4 + $0x58] sm:$0xf0] %vm617_vm3, %v1583_v13 }
 0x1c5   : > { %v599_v19 = vld [vmem:[#allocation2] sm:$0xf]  ;;  %630 = vst.msk [vmem:[#allocation4 + $0x70] sm:$0xf0] %vm617_vm3, %v1583_v13 }
 0x1c6   : > { %v606_v20 = vld [vmem:[#allocation2 + $0x8] sm:$0xf]  ;;  %601 = vrot.lane.b32.xlu1 %v599_v19, %s1584_s29  ;;  %633 = vst.msk [vmem:[#allocation4 + $0x88] sm:$0xf0] %vm617_vm3, %v1583_v13 }
 0x1c7   : > { %608 = vrot.lane.b32.xlu0 %v606_v20, %s1585_s8  ;;  %636 = vst.msk [vmem:[#allocation4 + $0xa0] sm:$0xf0] %vm617_vm3, %v1583_v13 }
 0x1c8   : > { %639 = vst.msk [vmem:[#allocation4 + $0xb8] sm:$0xf0] %vm617_vm3, %v1583_v13  ;;  %vm2045_vm3 = vcmask 1031168  }
 0x238   : > { %v602_v21 = vpop.permute.xlu1 %601 }
 0x239   : > { %v609_v22 = vpop.permute.xlu0 %608  ;;  %605 = vst.msk [vmem:[#allocation2] sm:$0xf] %vm604_vm6, %v602_v21  ;;  %vm811_vm6 = vcmask 752640  }
 0x23a   : > { %612 = vst.msk [vmem:[#allocation2 + $0x8] sm:$0xf] %vm611_vm14, %v609_v22  ;;  %vm861_vm14 = vcmask 736256  }
 0x23b   : > { %614 = vst.msk [vmem:[#allocation2 + $0x8] sm:$0xf] %vm613_vm15, %v1583_v13  ;;  %vm2048_vm15 = vcmask 744448  }
 0x240   : > { %v1756_v23 = vld [vmem:[#allocation2] sm:$0xff] }
 0x241   : > { %659 = vst [vmem:[#allocation1] ss:$2 sm:$0xff] %v1756_v23 }
 0x242   : > { %v656_v24 = vld [vmem:[#allocation2 + $0x8] sm:$0xf] }
 0x243   : > { %661 = vst [vmem:[#allocation1 + $0x10] ss:$2 sm:$0xff] %v656_v24  ;;  %v673_v27 = vld [vmem:[#allocation2 + $0x8] sm:$0xf] }
 0x244   : > { %v698_v31 = vld [vmem:[#allocation2 + $0x8] sm:$0xf] }
 0x245   : > { %v723_v35 = vld [vmem:[#allocation2 + $0x8] sm:$0xf] }
 0x246   : > { %v747_v39 = vld [vmem:[#allocation2 + $0x8] sm:$0xf] }
 0x247   : > { %v772_v43 = vld [vmem:[#allocation2 + $0x8] sm:$0xf] }
 0x248   : > { %v662_v25 = vld.sshfl [vmem:[#allocation1] sm:$0xff pattern:$0x75316420]  ;;  %v663_v26 = vld.sshfl [vmem:[#allocation1 + $0x8] sm:$0xff pattern:$0x75316420] }
 0x249   : > { %676 = vst [vmem:[#allocation1] ss:$2 sm:$0xff] %v1756_v23  ;;  %v796_v47 = vld [vmem:[#allocation2 + $0x8] sm:$0xf] }
 0x24a   : > { %668 = vst [vmem:[#allocation4] sm:$0xf] %v662_v25  ;;  %v1760_v28 = vld.sshfl [vmem:[#allocation1 + $0x10] sm:$0xff pattern:$0x75316420] }
 0x24b   : > { %669 = vst [vmem:[#allocation4 + $0x8] sm:$0xf] %v663_v26  ;;  %v821_v54 = vld [vmem:[#allocation2 + $0x8] sm:$0xf] }
 0x24c   : > { %678 = vst [vmem:[#allocation1 + $0x10] ss:$2 sm:$0xff] %v673_v27  ;;  %v846_v58 = vld [vmem:[#allocation2 + $0x8] sm:$0xf] }
 0x24d   : > { %671 = vst.msk [vmem:[#allocation4 + $0x10] sm:$0xf] %vm670_vm0, %v1760_v28 }
 0x250   : > { %v1762_v29 = vld.sshfl [vmem:[#allocation1] sm:$0xff pattern:$0x75316420]  ;;  %v1764_v30 = vld.sshfl [vmem:[#allocation1 + $0x8] sm:$0xff pattern:$0x75316420] }
 0x251   : > { %701 = vst [vmem:[#allocation1] ss:$2 sm:$0xff] %v1756_v23 }
 0x253   : > { %v681_v32 = vld.sshfl [vmem:[#allocation1 + $0x10] sm:$0xff pattern:$0x75316420] }
 0x254   : > { %703 = vst [vmem:[#allocation1 + $0x10] ss:$2 sm:$0xff] %v698_v31  ;;  %v649_v31 = vld [vmem:[%s2040_s3] sm:$0xff] }
 0x258   : > { %v704_v33 = vld.sshfl [vmem:[#allocation1] sm:$0xff pattern:$0x75316420]  ;;  %v1767_v34 = vld.sshfl [vmem:[#allocation1 + $0x8] sm:$0xff pattern:$0x75316420] }
 0x259   : > { %726 = vst [vmem:[#allocation1] ss:$2 sm:$0xff] %v1756_v23 }
 0x25b   : > { %v706_v36 = vld.sshfl [vmem:[#allocation1 + $0x10] sm:$0xff pattern:$0x75316420] }
 0x25c   : > { %711 = vrot.lane.b32.xlu0 %v706_v36, %s1586_s9  ;;  %728 = vst [vmem:[#allocation1 + $0x10] ss:$2 sm:$0xff] %v723_v35 }
 0x260   : > { %v729_v37 = vld.sshfl [vmem:[#allocation1] sm:$0xff pattern:$0x75316420]  ;;  %v730_v38 = vld.sshfl [vmem:[#allocation1 + $0x8] sm:$0xff pattern:$0x75316420] }
 0x261   : > { %732 = vrot.lane.b32.xlu1 %v729_v37, %s1579_s26  ;;  %750 = vst [vmem:[#allocation1] ss:$2 sm:$0xff] %v1756_v23 }
 0x263   : > { %v731_v40 = vld.sshfl [vmem:[#allocation1 + $0x10] sm:$0xff pattern:$0x75316420] }
 0x264   : > { %736 = vrot.lane.b32.xlu0 %v731_v40, %s1579_s26  ;;  %752 = vst [vmem:[#allocation1 + $0x10] ss:$2 sm:$0xff] %v747_v39 }
 0x268   : > { %v754_v41 = vld.sshfl [vmem:[#allocation1 + $0x8] sm:$0xff pattern:$0x75316420]  ;;  %v753_v42 = vld.sshfl [vmem:[#allocation1] sm:$0xff pattern:$0x75316420] }
 0x269   : > { %758 = vrot.lane.b32.xlu2 %v754_v41, %s1587_s10  ;;  %756 = vrot.lane.b32.xlu1 %v753_v42, %s1587_s10  ;;  %775 = vst [vmem:[#allocation1] ss:$2 sm:$0xff] %v1756_v23 }
 0x26b   : > { %v755_v44 = vld.sshfl [vmem:[#allocation1 + $0x10] sm:$0xff pattern:$0x75316420] }
 0x26c   : > { %760 = vrot.lane.b32.xlu0 %v755_v44, %s1587_s10  ;;  %777 = vst [vmem:[#allocation1 + $0x10] ss:$2 sm:$0xff] %v772_v43 }
 0x270   : > { %v779_v45 = vld.sshfl [vmem:[#allocation1 + $0x8] sm:$0xff pattern:$0x75316420]  ;;  %v778_v46 = vld.sshfl [vmem:[#allocation1] sm:$0xff pattern:$0x75316420] }
 0x271   : > { %783 = vrot.lane.b32.xlu2 %v779_v45, %s1580_s27  ;;  %781 = vrot.lane.b32.xlu1 %v778_v46, %s1580_s27  ;;  %799 = vst [vmem:[#allocation1] ss:$2 sm:$0xff] %v1756_v23 }
 0x273   : > { %v780_v51 = vld.sshfl [vmem:[#allocation1 + $0x10] sm:$0xff pattern:$0x75316420] }
 0x274   : > { %785 = vrot.lane.b32.xlu0 %v780_v51, %s1580_s27  ;;  %801 = vst [vmem:[#allocation1 + $0x10] ss:$2 sm:$0xff] %v796_v47 }
 0x278   : > { %v803_v52 = vld.sshfl [vmem:[#allocation1 + $0x8] sm:$0xff pattern:$0x75316420]  ;;  %v802_v53 = vld.sshfl [vmem:[#allocation1] sm:$0xff pattern:$0x75316420] }
 0x279   : > { %807 = vrot.lane.b32.xlu2 %v803_v52, %s1584_s29  ;;  %805 = vrot.lane.b32.xlu1 %v802_v53, %s1584_s29  ;;  %824 = vst [vmem:[#allocation1] ss:$2 sm:$0xff] %v1756_v23 }
 0x27b   : > { %v804_v55 = vld.sshfl [vmem:[#allocation1 + $0x10] sm:$0xff pattern:$0x75316420] }
 0x27c   : > { %809 = vrot.lane.b32.xlu0 %v804_v55, %s1584_s29  ;;  %826 = vst [vmem:[#allocation1 + $0x10] ss:$2 sm:$0xff] %v821_v54 }
 0x280   : > { %v828_v49 = vld.sshfl [vmem:[#allocation1 + $0x8] sm:$0xff pattern:$0x75316420]  ;;  %v827_v57 = vld.sshfl [vmem:[#allocation1] sm:$0xff pattern:$0x75316420] }
 0x281   : > { %832 = vrot.lane.b32.xlu2 %v828_v49, %s1588_s11  ;;  %830 = vrot.lane.b32.xlu1 %v827_v57, %s1588_s11  ;;  %849 = vst [vmem:[#allocation1] ss:$2 sm:$0xff] %v1756_v23 }
 0x283   : > { %v829_v59 = vld.sshfl [vmem:[#allocation1 + $0x10] sm:$0xff pattern:$0x75316420] }
 0x284   : > { %834 = vrot.lane.b32.xlu0 %v829_v59, %s1588_s11  ;;  %851 = vst [vmem:[#allocation1 + $0x10] ss:$2 sm:$0xff] %v846_v58 }
 0x288   : > { %v853_v48 = vld.sshfl [vmem:[#allocation1 + $0x8] sm:$0xff pattern:$0x75316420]  ;;  %v852_v60 = vld.sshfl [vmem:[#allocation1] sm:$0xff pattern:$0x75316420] }
 0x289   : > { %857 = vrot.lane.b32.xlu2 %v853_v48, %s1589_s12  ;;  %855 = vrot.lane.b32.xlu1 %v852_v60, %s1589_s12 }
 0x28b   : > { %v854_v61 = vld.sshfl [vmem:[#allocation1 + $0x10] sm:$0xff pattern:$0x75316420] }
 0x28c   : > { %686 = vrot.lane.b32.xlu0 %v681_v32, %s1590_s13  ;;  %v643_v32 = vld [vmem:[%s2039_s2] sm:$0xff] }
 0x291   : > { %859 = vrot.lane.b32.xlu2 %v854_v61, %s1589_s12  ;;  %707 = vrot.lane.b32.xlu1 %v704_v33, %s1586_s9 }
 0x294   : > { %682 = vrot.lane.b32.xlu0 %v1762_v29, %s1590_s13 }
 0x299   : > { %734 = vrot.lane.b32.xlu2 %v730_v38, %s1579_s26  ;;  %684 = vrot.lane.b32.xlu1 %v1764_v30, %s1590_s13 }
 0x29c   : > { %652 = vperm.xlu0 %1552, %v649_v31  }
 0x2a1   : > { %709 = vrot.lane.b32.xlu2 %v1767_v34, %s1586_s9 }
 0x2a9   : > { %646 = vperm.xlu2 %1551, %v643_v32  }
 0x2c3   : > { %v759_v63 = vpop.permute.xlu2 %758 }
 0x2cb   : > { %v784_v0 = vpop.permute.xlu2 %783 }
 0x2ce   : > { %v712_v1 = vpop.permute.xlu0 %711 }
 0x2cf   : > { %721 = vst.msk [vmem:[#allocation4 + $0x40] sm:$0xf] %vm670_vm0, %v712_v1 }
 0x2d3   : > { %v733_v2 = vpop.permute.xlu1 %732  ;;  %v808_v3 = vpop.permute.xlu2 %807 }
 0x2d6   : > { %v737_v4 = vpop.permute.xlu0 %736  ;;  %v879_v57 = vld [vmem:[#allocation4 + $0x40] sm:$0xff] }
 0x2d7   : > { %745 = vst.msk [vmem:[#allocation4 + $0x58] sm:$0xf] %vm670_vm0, %v737_v4 }
 0x2db   : > { %v757_v5 = vpop.permute.xlu1 %756  ;;  %v833_v6 = vpop.permute.xlu2 %832 }
 0x2dc   : > { %v763_v7 = vsel %vm762_vm4, %v757_v5, %v759_v63 }
 0x2dd   : > { %768 = vst [vmem:[#allocation4 + $0x60] sm:$0xf] %v763_v7  ;;  %v871_v7 = vld [vmem:[#allocation4] sm:$0xff] }
 0x2de   : > { %v761_v8 = vpop.permute.xlu0 %760  ;;  %v882_v54 = vld [vmem:[#allocation4 + $0x58] sm:$0xff] }
 0x2df   : > { %v764_v9 = vsel %vm762_vm4, %v759_v63, %v761_v8  ;;  %770 = vst.msk [vmem:[#allocation4 + $0x70] sm:$0xf] %vm670_vm0, %v761_v8  ;;  %v872_v8 = vld [vmem:[#allocation4 + $0x8] sm:$0xff] }
 0x2e0   : > { %769 = vst [vmem:[#allocation4 + $0x68] sm:$0xf] %v764_v9 }
 0x2e3   : > { %v782_v10 = vpop.permute.xlu1 %781  ;;  %v858_v11 = vpop.permute.xlu2 %857 }
 0x2e4   : > { %v787_v12 = vsel %vm568_vm7, %v782_v10, %v784_v0 }
 0x2e5   : > { %792 = vst [vmem:[#allocation4 + $0x78] sm:$0xf] %v787_v12 }
 0x2e6   : > { %v786_v14 = vpop.permute.xlu0 %785  ;;  %v885_v51 = vld [vmem:[#allocation4 + $0x70] sm:$0xff] }
 0x2e7   : > { %v788_v15 = vsel %vm568_vm7, %v784_v0, %v786_v14  ;;  %794 = vst.msk [vmem:[#allocation4 + $0x88] sm:$0xf] %vm670_vm0, %v786_v14  ;;  %v884_v46 = vld [vmem:[#allocation4 + $0x68] sm:$0xff]  ;;  %v873_v0 = vld [vmem:[#allocation4 + $0x10] sm:$0xff] }
 0x2e8   : > { %793 = vst [vmem:[#allocation4 + $0x80] sm:$0xf] %v788_v15 }
 0x2eb   : > { %v806_v16 = vpop.permute.xlu1 %805  ;;  %v860_v17 = vpop.permute.xlu2 %859 }
 0x2ec   : > { %v812_v18 = vsel %vm811_vm6, %v806_v16, %v808_v3  ;;  %v863_v19 = vsel %vm861_vm14, %v858_v11, %v860_v17  ;;  %869 = vst.msk [vmem:[#allocation4 + $0xd0] sm:$0xf] %vm670_vm0, %v860_v17  ;;  %v886_v48 = vld [vmem:[#allocation4 + $0x78] sm:$0xff] }
 0x2ed   : > { %817 = vst [vmem:[#allocation4 + $0x90] sm:$0xf] %v812_v18 }
 0x2ee   : > { %868 = vst [vmem:[#allocation4 + $0xc8] sm:$0xf] %v863_v19  ;;  %v810_v20 = vpop.permute.xlu0 %809  ;;  %v888_v44 = vld [vmem:[#allocation4 + $0x88] sm:$0xff] }
 0x2ef   : > { %v813_v21 = vsel %vm811_vm6, %v808_v3, %v810_v20  ;;  %819 = vst.msk [vmem:[#allocation4 + $0xa0] sm:$0xf] %vm670_vm0, %v810_v20  ;;  %v887_v42 = vld [vmem:[#allocation4 + $0x80] sm:$0xff] }
 0x2f0   : > { %818 = vst [vmem:[#allocation4 + $0x98] sm:$0xf] %v813_v21 }
 0x2f3   : > { %v831_v22 = vpop.permute.xlu1 %830  ;;  %v735_v23 = vpop.permute.xlu2 %734  ;;  %v897_v24 = vld [vmem:[#allocation4 + $0xd0] sm:$0xff] }
 0x2f4   : > { %v837_v25 = vsel %vm2048_vm15, %v831_v22, %v833_v6  ;;  %v738_v26 = vsel %vm547_vm9, %v733_v2, %v735_v23  ;;  %v739_v27 = vsel %vm547_vm9, %v735_v23, %v737_v4  ;;  %949 = vmatpush.msra.mxu2 %v897_v24  ;;  %v889_v49 = vld [vmem:[#allocation4 + $0x90] sm:$0xff] }
 0x2f5   : > { %842 = vst [vmem:[#allocation4 + $0xa8] sm:$0xf] %v837_v25  ;;  %v896_v28 = vld [vmem:[#allocation4 + $0xc8] sm:$0xff]  ;;  %v870_v2 = vld [vmem:[%s2038_s1] sm:$0xff] }
 0x2f6   : > { %743 = vst [vmem:[#allocation4 + $0x48] sm:$0xf] %v738_v26  ;;  %v835_v29 = vpop.permute.xlu0 %834  ;;  %929 = vmatpush.msra.mxu1 %v896_v28  ;;  %v891_v41 = vld [vmem:[#allocation4 + $0xa0] sm:$0xff] }
 0x2f7   : > { %744 = vst [vmem:[#allocation4 + $0x50] sm:$0xf] %v739_v27  ;;  %v838_v30 = vsel %vm2048_vm15, %v833_v6, %v835_v29  ;;  %v890_v40 = vld [vmem:[#allocation4 + $0x98] sm:$0xff]  ;;  %vm980_vm15 = vcmask 154624  }
 0x2f8   : > { %843 = vst [vmem:[#allocation4 + $0xb0] sm:$0xf] %v838_v30 }
 0x2f9   : > { %844 = vst.msk [vmem:[#allocation4 + $0xb8] sm:$0xf] %vm670_vm0, %v835_v29 }
 0x2fb   : > { %v710_v33 = vpop.permute.xlu2 %709  ;;  %v856_v34 = vpop.permute.xlu1 %855 }
 0x2fc   : > { %v715_v35 = vsel %vm2045_vm3, %v710_v33, %v712_v1  ;;  %v862_v36 = vsel %vm861_vm14, %v856_v34, %v858_v11  ;;  %v892_v53 = vld [vmem:[#allocation4 + $0xa8] sm:$0xff]  ;;  %v883_v1 = vld [vmem:[#allocation4 + $0x60] sm:$0xff] }
 0x2fd   : > { %720 = vst [vmem:[#allocation4 + $0x38] sm:$0xf] %v715_v35  ;;  %v880_v3 = vld [vmem:[#allocation4 + $0x48] sm:$0xff] }
 0x2fe   : > { %867 = vst [vmem:[#allocation4 + $0xc0] sm:$0xf] %v862_v36  ;;  %v687_v37 = vpop.permute.xlu0 %686  ;;  %v881_v52 = vld [vmem:[#allocation4 + $0x50] sm:$0xff] }
 0x2ff   : > { %696 = vst.msk [vmem:[#allocation4 + $0x28] sm:$0xf] %vm670_vm0, %v687_v37  ;;  %v893_v38 = vld [vmem:[#allocation4 + $0xb0] sm:$0xff]  ;;  %vm2047_vm0 = vcmask 1039360  }
 0x300   : > { %v894_v39 = vld [vmem:[#allocation4 + $0xb8] sm:$0xff]  ;;  %930 = vmatpush.msra.mxu1 %v893_v38 }
 0x301   : > { %950 = vmatpush.msra.mxu2 %v894_v39 }
 0x302   : > { %931 = vmatpush.msra.mxu1 %v890_v40 }
 0x303   : > { %951 = vmatpush.msra.mxu2 %v891_v41  ;;  %v708_v43 = vpop.permute.xlu1 %707  ;;  %v647_v9 = vpop.permute.xlu2 %646 }
 0x304   : > { %932 = vmatpush.msra.mxu1 %v887_v42  ;;  %v714_v45 = vsel %vm2045_vm3, %v708_v43, %v710_v33  ;;  %v878_v55 = vld [vmem:[#allocation4 + $0x38] sm:$0xff]  ;;  %vm2046_vm3 = vcmask 588800  }
 0x305   : > { %952 = vmatpush.msra.mxu2 %v888_v44  ;;  %719 = vst [vmem:[#allocation4 + $0x30] sm:$0xf] %v714_v45  ;;  %v895_v47 = vld [vmem:[#allocation4 + $0xc0] sm:$0xff] }
 0x306   : > { %933 = vmatpush.msra.mxu1 %v884_v46  ;;  %909 = vmatpush.msra.mxu0 %v895_v47  ;;  %v876_v58 = vld [vmem:[#allocation4 + $0x28] sm:$0xff]  ;;  %v683_v59 = vpop.permute.xlu0 %682 }
 0x307   : > { %953 = vmatpush.msra.mxu2 %v885_v51 }
 0x308   : > { %934 = vmatpush.msra.mxu1 %v881_v52  ;;  %910 = vmatpush.msra.mxu0 %v892_v53 }
 0x309   : > { %954 = vmatpush.msra.mxu2 %v882_v54 }
 0x30a   : > { %935 = vmatpush.msra.mxu1 %v878_v55  ;;  %911 = vmatpush.msra.mxu0 %v889_v49 }
 0x30b   : > { %955 = vmatpush.msra.mxu2 %v879_v57  ;;  %v685_v60 = vpop.permute.xlu1 %684 }
 0x30c   : > { %912 = vmatpush.msra.mxu0 %v886_v48  ;;  %v689_v61 = vsel %vm2047_vm0, %v683_v59, %v685_v60  ;;  %v690_v63 = vsel %vm2047_vm0, %v685_v60, %v687_v37  ;;  %v877_v4 = vld [vmem:[#allocation4 + $0x30] sm:$0xff]  ;;  %vm989_vm0 = vcmask 416768  }
 0x30d   : > { %694 = vst [vmem:[#allocation4 + $0x18] sm:$0xf] %v689_v61  ;;  %956 = vmatpush.msra.mxu2 %v876_v58 }
 0x30e   : > { %695 = vst [vmem:[#allocation4 + $0x20] sm:$0xf] %v690_v63  ;;  %913 = vmatpush.msra.mxu0 %v883_v1  ;;  %v653_v11 = vpop.permute.xlu0 %652  ;;  %v1076_v63 = vld [vmem:[%s2043_s6] sm:$0xff] }
 0x30f   : > { %957 = vmatpush.msra.mxu2 %v873_v0 }
 0x310   : > { %914 = vmatpush.msra.mxu0 %v880_v3  ;;  %1495 = vmatmul.msk.f32.vlgmr.msra.gmra.mxu2 %vm2046_vm3, %v870_v2 }
 0x312   : > { %915 = vmatpush.msra.mxu0 %v877_v4 }
 0x314   : > { %v874_v5 = vld [vmem:[#allocation4 + $0x18] sm:$0xff] }
 0x315   : > { %916 = vmatpush.msra.mxu0 %v874_v5  ;;  %v875_v6 = vld [vmem:[#allocation4 + $0x20] sm:$0xff] }
 0x316   : > { %936 = vmatpush.msra.mxu1 %v875_v6 }
 0x317   : > { %917 = vmatpush.msra.mxu0 %v871_v7 }
 0x318   : > { %937 = vmatpush.msra.mxu1 %v872_v8  ;;  %1493 = vmatmul.msk.f32.vlgmr.msra.gmra.mxu0 %vm2046_vm3, %v870_v2 }
 0x319   : > { %1494 = vmatmul.msk.f32.vlgmr.msra.gmra.mxu1 %vm2046_vm3, %v870_v2  ;;  %vm986_vm3 = vcmask 1047704  }
 0x393   : > { %v959_v15 = vpop.f32.mrf.mxu2 }
 0x394   : > { %v964_v19 = vmul.f32 %v959_v15, %v647_v9 }
 0x395   : > { %v919_v10 = vpop.f32.mrf.mxu0 }
 0x396   : > { %v962_v12 = vmul.f32 %v919_v10, %v647_v9  ;;  %v939_v14 = vpop.f32.mrf.mxu1  ;;  %v967_v22 = vadd.f32 %v964_v19, %v653_v11 }
 0x397   : > { %v963_v16 = vmul.f32 %v939_v14, %v647_v9 }
 0x398   : > { %v965_v17 = vadd.f32 %v962_v12, %v653_v11  ;;  %v970_v23 = vmax.f32 %v967_v22, 0.0 }
 0x399   : > { %v966_v18 = vadd.f32 %v963_v16, %v653_v11 }
 0x39a   : > { %v968_v20 = vmax.f32 %v965_v17, 0.0 }
 0x39b   : > { %v969_v21 = vmax.f32 %v966_v18, 0.0 }
 0x39c   : > { %974 = vrot.lane.b32.xlu1 %v968_v20, %s1562_s30  ;;  %v1070_v20 = vld [vmem:[%s2042_s5] sm:$0xff] }
 0x39d   : > { %976 = vrot.lane.b32.xlu2 %v969_v21, %s1562_s30 }
 0x3a4   : > { %978 = vrot.lane.b32.xlu1 %v970_v23, %s1562_s30 }
 0x3f7   : > { %v977_v25 = vpop.permute.xlu2 %976 }
 0x40e   : > { %v975_v24 = vpop.permute.xlu1 %974 }
 0x40f   : > { %987 = vst.msk [vmem:[#allocation3] sm:$0xff] %vm986_vm3, %v975_v24  ;;  %v981_v29 = vsel %vm980_vm15, %v975_v24, %v977_v25 }
 0x416   : > { %v979_v26 = vpop.permute.xlu1 %978  ;;  %v991_v27 = vld [vmem:[#allocation3] sm:$0xff] }
 0x417   : > { %v982_v28 = vsel %vm980_vm15, %v977_v25, %v979_v26  ;;  %1022 = vrot.lane.b32.xlu0 %v991_v27, %s1580_s27  ;;  %1008 = vrot.lane.b32.xlu1 %v991_v27, %s1579_s26  ;;  %v1964_v25 = vld [vmem:[%s2041_s4] sm:$0xff]  ;;  %vm2052_vm15 = vcmask 588800  }
 0x418   : > { %990 = vst.msk [vmem:[#allocation3 + $0x10] sm:$0xff] %vm989_vm0, %v982_v28  ;;  %997 = vrot.lane.b32.xlu2 %v991_v27, %s1578_s23 }
 0x41f   : > { %1024 = vrot.lane.b32.xlu1 %v981_v29, %s1580_s27  ;;  %999 = vrot.lane.b32.xlu0 %v981_v29, %s1578_s23  ;;  %v993_v30 = vld [vmem:[#allocation3 + $0x10] sm:$0xff] }
 0x420   : > { %1010 = vrot.lane.b32.xlu2 %v981_v29, %s1579_s26 }
 0x427   : > { %1026 = vrot.lane.b32.xlu1 %v993_v30, %s1580_s27  ;;  %1012 = vrot.lane.b32.xlu0 %v993_v30, %s1579_s26 }
 0x428   : > { %1001 = vrot.lane.b32.xlu2 %v993_v30, %s1578_s23 }
 0x472   : > { %v998_v31 = vpop.permute.xlu2 %997 }
 0x47a   : > { %v1011_v34 = vpop.permute.xlu2 %1010 }
 0x482   : > { %v1002_v42 = vpop.permute.xlu2 %1001 }
 0x489   : > { %v1023_v32 = vpop.permute.xlu0 %1022  ;;  %v1009_v33 = vpop.permute.xlu1 %1008 }
 0x48a   : > { %v1014_v37 = vsel %vm547_vm9, %v1009_v33, %v1011_v34 }
 0x491   : > { %v1000_v35 = vpop.permute.xlu0 %999  ;;  %v1025_v36 = vpop.permute.xlu1 %1024 }
 0x492   : > { %v1003_v38 = vsel %vm529_vm8, %v998_v31, %v1000_v35  ;;  %v1028_v39 = vsel %vm568_vm7, %v1023_v32, %v1025_v36  ;;  %v1004_v45 = vsel %vm529_vm8, %v1000_v35, %v1002_v42  ;;  %vm1050_vm8 = vcmask 1047696  }
 0x493   : > { %v1019_v40 = vsel %vm510_vm12, %v1003_v38, %v1014_v37  ;;  %vm2049_vm12 = vcmask 744448  }
 0x494   : > { %v1033_v41 = vsel %vm507_vm13, %v1028_v39, %v1019_v40  ;;  %vm2050_vm13 = vcmask 1031168  }
 0x495   : > { %1039 = vrot.lane.b32.xlu2 %v1033_v41, %s1582_s28  ;;  %vm2053_vm3 = vmmov %vm2050_vm13 }
 0x499   : > { %v1013_v43 = vpop.permute.xlu0 %1012  ;;  %v1027_v44 = vpop.permute.xlu1 %1026 }
 0x49a   : > { %v1015_v46 = vsel %vm547_vm9, %v1011_v34, %v1013_v43  ;;  %v1021_v47 = vsel %vm512_vm2, %v1002_v42, %v1013_v43  ;;  %v1029_v51 = vsel %vm568_vm7, %v1025_v36, %v1027_v44  ;;  %vm1053_vm2 = vcmask 408576  }
 0x49b   : > { %v1035_v52 = vsel %vm509_vm5, %v1027_v44, %v1021_v47  ;;  %v1020_v62 = vsel %vm511_vm10, %v1004_v45, %v1015_v46  ;;  %vm1066_vm5 = vcmask 556432   ;;  %vm1068_vm10 = vcmask 572960  }
 0x49c   : > { %1043 = vrot.lane.b32.xlu1 %v1035_v52, %s1582_s28  ;;  %v1034_v53 = vsel %vm508_vm11, %v1029_v51, %v1020_v62  ;;  %vm1087_vm11 = vcmask 261120  }
 0x49d   : > { %1041 = vrot.lane.b32.xlu0 %v1034_v53, %s1582_s28 }
 0x4ef   : > { %v1040_v54 = vpop.permute.xlu2 %1039 }
 0x4f0   : > { %1051 = vst.msk [vmem:[#allocation3] sm:$0xff] %vm1050_vm8, %v1040_v54  ;;  %vm2055_vm8 = vmmov %vm2049_vm12 }
 0x4f7   : > { %v1055_v55 = vld [vmem:[#allocation3] sm:$0xff] }
 0x4f8   : > { %1057 = vrot.lane.b32.xlu2 %v1055_v55, %s1584_s29 }
 0x50e   : > { %v1044_v49 = vpop.permute.xlu1 %1043 }
 0x50f   : > { %v1042_v56 = vpop.permute.xlu0 %1041 }
 0x510   : > { %v1884_v57 = vsel %vm588_vm1, %v1040_v54, %v1042_v56  ;;  %v1046_v58 = vsel %vm588_vm1, %v1042_v56, %v1044_v49 }
 0x511   : > { %1237 = vrot.lane.b32.xlu2 %v1884_v57, %s1589_s12  ;;  %1217 = vrot.lane.b32.xlu1 %v1884_v57, %s1588_s11  ;;  %1054 = vst.msk [vmem:[#allocation3 + $0x10] sm:$0xff] %vm1053_vm2, %v1046_v58  ;;  %vm1365_vm2 = vcmask 523648  }
 0x512   : > { %1086 = vst [vmem:[#allocation4 + $0x8] sm:$0xff] %v1884_v57 }
 0x518   : > { %v1061_v50 = vld [vmem:[#allocation3 + $0x10] sm:$0xff] }
 0x519   : > { %1063 = vrot.lane.b32.xlu0 %v1061_v50, %s1585_s8  ;;  %s1502_s8 = sshll.u32 %s2059_s25, 4  ;;  %s1594_s25 = smov 118  }
 0x521   : > { %1197 = vrot.lane.b32.xlu0 %v1884_v57, %s1584_s29 }
 0x529   : > { %1177 = vrot.lane.b32.xlu0 %v1884_v57, %s1580_s27 }
 0x531   : > { %1157 = vrot.lane.b32.xlu0 %v1884_v57, %s1587_s10 }
 0x539   : > { %1137 = vrot.lane.b32.xlu0 %v1884_v57, %s1579_s26 }
 0x552   : > { %v1058_v59 = vpop.permute.xlu2 %1057 }
 0x553   : > { %1060 = vst.msk [vmem:[#allocation3] sm:$0xff] %vm588_vm1, %v1058_v59  ;;  %vm2051_vm1 = vcmask 1039360  }
 0x554   : > { %vm2054_vm0 = vmmov %vm2051_vm1 }
 0x55a   : > { %v1902_v48 = vld [vmem:[#allocation3] sm:$0xff] }
 0x55b   : > { %1085 = vst [vmem:[#allocation4] sm:$0xff] %v1902_v48  ;;  %1195 = vrot.lane.b32.xlu2 %v1902_v48, %s1584_s29  ;;  %1235 = vrot.lane.b32.xlu1 %v1902_v48, %s1589_s12 }
 0x55c   : > { %1215 = vrot.lane.b32.xlu0 %v1902_v48, %s1588_s11 }
 0x563   : > { %1175 = vrot.lane.b32.xlu2 %v1902_v48, %s1580_s27 }
 0x564   : > { %1117 = vrot.lane.b32.xlu0 %v1884_v57, %s1586_s9 }
 0x56b   : > { %1155 = vrot.lane.b32.xlu2 %v1902_v48, %s1587_s10  ;;  %v1238_v1 = vpop.permute.xlu2 %1237 }
 0x56c   : > { %1097 = vrot.lane.b32.xlu0 %v1884_v57, %s1590_s13 }
 0x573   : > { %1135 = vrot.lane.b32.xlu2 %v1902_v48, %s1579_s26 }
 0x57b   : > { %1115 = vrot.lane.b32.xlu2 %v1902_v48, %s1586_s9 }
 0x583   : > { %1095 = vrot.lane.b32.xlu2 %v1902_v48, %s1590_s13  ;;  %v1218_v7 = vpop.permute.xlu1 %1217 }
 0x58b   : > { %v1064_v60 = vpop.permute.xlu0 %1063 }
 0x58c   : > { %1067 = vst.msk [vmem:[#allocation3 + $0x10] sm:$0xff] %vm1066_vm5, %v1064_v60  ;;  %vm1370_vm5 = vcmask 654848  }
 0x58d   : > { %1069 = vst.msk [vmem:[#allocation3 + $0x10] sm:$0xff] %vm1068_vm10, %v1583_v13  ;;  %vm1375_vm10 = vcmask 786048  }
 0x593   : > { %v1934_v0 = vpop.permute.xlu0 %1197 }
 0x594   : > { %v1084_v61 = vld [vmem:[#allocation3 + $0x10] sm:$0xff] }
 0x595   : > { %1119 = vrot.lane.b32.xlu2 %v1084_v61, %s1586_s9  ;;  %1239 = vrot.lane.b32.xlu1 %v1084_v61, %s1589_s12  ;;  %1088 = vst.msk [vmem:[#allocation4 + $0x10] sm:$0xff] %vm1087_vm11, %v1084_v61  ;;  %s1998_s12 = scalar_lea.vmem %s2044_s7, %s1502_s8 }
 0x596   : > { %1099 = vrot.lane.b32.xlu0 %v1084_v61, %s1590_s13  ;;  %s1591_s13 = smov 122  }
 0x59b   : > { %v1937_v13 = vpop.permute.xlu0 %1177 }
 0x59c   : > { %v1252_v62 = vld [vmem:[#allocation4 + $0x10] sm:$0xff] }
 0x59d   : > { %1079 = vperm.xlu2 %1551, %v1076_v63   ;;  %1219 = vrot.lane.b32.xlu1 %v1084_v61, %s1588_s11 }
 0x5a3   : > { %v1942_v4 = vpop.permute.xlu0 %1157 }
 0x5a5   : > { %1199 = vrot.lane.b32.xlu1 %v1084_v61, %s1584_s29 }
 0x5ab   : > { %v1948_v9 = vpop.permute.xlu0 %1137 }
 0x5ad   : > { %1179 = vrot.lane.b32.xlu1 %v1084_v61, %s1580_s27 }
 0x5b5   : > { %v1196_v2 = vpop.permute.xlu2 %1195  ;;  %1159 = vrot.lane.b32.xlu1 %v1084_v61, %s1587_s10 }
 0x5b6   : > { %v1201_v3 = vsel %vm811_vm6, %v1196_v2, %v1934_v0 }
 0x5b7   : > { %1206 = vst [vmem:[#allocation4 + $0x90] sm:$0xff] %v1201_v3 }
 0x5bd   : > { %v1176_v5 = vpop.permute.xlu2 %1175  ;;  %1139 = vrot.lane.b32.xlu1 %v1084_v61, %s1579_s26 }
 0x5be   : > { %v1181_v6 = vsel %vm568_vm7, %v1176_v5, %v1937_v13 }
 0x5bf   : > { %1186 = vst [vmem:[#allocation4 + $0x78] sm:$0xff] %v1181_v6 }
 0x5c5   : > { %v1156_v8 = vpop.permute.xlu2 %1155  ;;  %1073 = vperm.xlu1 %1553, %v1070_v20  }
 0x5c6   : > { %v1161_v10 = vsel %vm762_vm4, %v1156_v8, %v1942_v4 }
 0x5c7   : > { %1166 = vst [vmem:[#allocation4 + $0x60] sm:$0xff] %v1161_v10 }
 0x5cd   : > { %v1136_v11 = vpop.permute.xlu2 %1135  ;;  %v1236_v12 = vpop.permute.xlu1 %1235 }
 0x5ce   : > { %v1141_v14 = vsel %vm547_vm9, %v1136_v11, %v1948_v9  ;;  %v1241_v15 = vsel %vm861_vm14, %v1236_v12, %v1238_v1  ;;  %v1216_v16 = vpop.permute.xlu0 %1215 }
 0x5cf   : > { %1146 = vst [vmem:[#allocation4 + $0x48] sm:$0xff] %v1141_v14  ;;  %v1221_v17 = vsel %vm2049_vm12, %v1216_v16, %v1218_v7  ;;  %1287 = vmatpush.msra.mxu3 %v1241_v15  ;;  %vm1421_vm12 = vcmask 818176  }
 0x5d0   : > { %1246 = vst [vmem:[#allocation4 + $0xc0] sm:$0xff] %v1241_v15 }
 0x5d1   : > { %1226 = vst [vmem:[#allocation4 + $0xa8] sm:$0xff] %v1221_v17  ;;  %1288 = vmatpush.msra.mxu3 %v1221_v17 }
 0x5d3   : > { %1289 = vmatpush.msra.mxu3 %v1201_v3 }
 0x5d5   : > { %v1116_v18 = vpop.permute.xlu2 %1115  ;;  %1290 = vmatpush.msra.mxu3 %v1181_v6 }
 0x5d6   : > { %v1118_v19 = vpop.permute.xlu0 %1117 }
 0x5d7   : > { %v1121_v21 = vsel %vm2050_vm13, %v1116_v18, %v1118_v19  ;;  %1291 = vmatpush.msra.mxu3 %v1161_v10  ;;  %vm1390_vm13 = vcmask 1048448  }
 0x5d8   : > { %1126 = vst [vmem:[#allocation4 + $0x30] sm:$0xff] %v1121_v21 }
 0x5d9   : > { %1292 = vmatpush.msra.mxu3 %v1141_v14 }
 0x5db   : > { %1293 = vmatpush.msra.mxu3 %v1121_v21 }
 0x5dd   : > { %v1096_v22 = vpop.permute.xlu2 %1095 }
 0x5de   : > { %v1098_v23 = vpop.permute.xlu0 %1097 }
 0x5df   : > { %v1101_v24 = vsel %vm2051_vm1, %v1096_v22, %v1098_v23  ;;  %vm1387_vm1 = vcmask 932864  }
 0x5e0   : > { %1106 = vst [vmem:[#allocation4 + $0x18] sm:$0xff] %v1101_v24  ;;  %1294 = vmatpush.msra.mxu3 %v1101_v24 }
 0x5e2   : > { %1295 = vmatpush.msra.mxu3 %v1902_v48 }
 0x5e3   : > { %1496 = vmatmul.msk.f32.vlgmr.msra.gmra.mxu3 %vm2052_vm15, %v1964_v25 }
 0x5ef   : > { %v1120_v26 = vpop.permute.xlu2 %1119 }
 0x5f0   : > { %v1122_v27 = vsel %vm2053_vm3, %v1118_v19, %v1120_v26  ;;  %1128 = vst.msk [vmem:[#allocation4 + $0x40] sm:$0xff] %vm1087_vm11, %v1120_v26 }
 0x5f1   : > { %1127 = vst [vmem:[#allocation4 + $0x38] sm:$0xff] %v1122_v27 }
 0x5f7   : > { %v1258_v51 = vld [vmem:[#allocation4 + $0x40] sm:$0xff]  ;;  %v1080_v49 = vpop.permute.xlu2 %1079 }
 0x607   : > { %v1240_v28 = vpop.permute.xlu1 %1239 }
 0x608   : > { %v1242_v29 = vsel %vm861_vm14, %v1238_v1, %v1240_v28  ;;  %1248 = vst.msk [vmem:[#allocation4 + $0xd0] sm:$0xff] %vm1087_vm11, %v1240_v28  ;;  %v1100_v30 = vpop.permute.xlu0 %1099  ;;  %vm1360_vm14 = vcmask 392448  }
 0x609   : > { %1247 = vst [vmem:[#allocation4 + $0xc8] sm:$0xff] %v1242_v29  ;;  %v1102_v31 = vsel %vm2054_vm0, %v1098_v23, %v1100_v30  ;;  %1307 = vmatpush.msrb.mxu0 %v1242_v29 }
 0x60a   : > { %1107 = vst [vmem:[#allocation4 + $0x20] sm:$0xff] %v1102_v31 }
 0x60b   : > { %1108 = vst.msk [vmem:[#allocation4 + $0x28] sm:$0xff] %vm1087_vm11, %v1100_v30 }
 0x60f   : > { %v1220_v32 = vpop.permute.xlu1 %1219  ;;  %v1276_v33 = vld [vmem:[#allocation4 + $0xd0] sm:$0xff] }
 0x610   : > { %v1222_v34 = vsel %vm2055_vm8, %v1218_v7, %v1220_v32  ;;  %1228 = vst.msk [vmem:[#allocation4 + $0xb8] sm:$0xff] %vm1087_vm11, %v1220_v32  ;;  %1327 = vmatpush.msrb.mxu1 %v1276_v33 }
 0x611   : > { %1227 = vst [vmem:[#allocation4 + $0xb0] sm:$0xff] %v1222_v34  ;;  %1308 = vmatpush.msrb.mxu0 %v1222_v34 }
 0x612   : > { %v1255_v52 = vld [vmem:[#allocation4 + $0x28] sm:$0xff] }
 0x617   : > { %v1200_v35 = vpop.permute.xlu1 %1199  ;;  %v1273_v36 = vld [vmem:[#allocation4 + $0xb8] sm:$0xff] }
 0x618   : > { %v1202_v37 = vsel %vm811_vm6, %v1934_v0, %v1200_v35  ;;  %1208 = vst.msk [vmem:[#allocation4 + $0xa0] sm:$0xff] %vm1087_vm11, %v1200_v35  ;;  %1328 = vmatpush.msrb.mxu1 %v1273_v36  ;;  %vm1355_vm6 = vcmask 261248  }
 0x619   : > { %1207 = vst [vmem:[#allocation4 + $0x98] sm:$0xff] %v1202_v37  ;;  %1309 = vmatpush.msrb.mxu0 %v1202_v37 }
 0x61f   : > { %v1180_v38 = vpop.permute.xlu1 %1179  ;;  %v1270_v39 = vld [vmem:[#allocation4 + $0xa0] sm:$0xff] }
 0x620   : > { %v1182_v40 = vsel %vm568_vm7, %v1937_v13, %v1180_v38  ;;  %1188 = vst.msk [vmem:[#allocation4 + $0x88] sm:$0xff] %vm1087_vm11, %v1180_v38  ;;  %1329 = vmatpush.msrb.mxu1 %v1270_v39  ;;  %vm2056_vm7 = vmmov %vm2052_vm15 }
 0x621   : > { %1187 = vst [vmem:[#allocation4 + $0x80] sm:$0xff] %v1182_v40  ;;  %1310 = vmatpush.msrb.mxu0 %v1182_v40 }
 0x627   : > { %v1160_v41 = vpop.permute.xlu1 %1159  ;;  %v1267_v42 = vld [vmem:[#allocation4 + $0x88] sm:$0xff] }
 0x628   : > { %v1162_v43 = vsel %vm762_vm4, %v1942_v4, %v1160_v41  ;;  %1168 = vst.msk [vmem:[#allocation4 + $0x70] sm:$0xff] %vm1087_vm11, %v1160_v41  ;;  %1330 = vmatpush.msrb.mxu1 %v1267_v42  ;;  %vm1349_vm4 = vcmask 130048  }
 0x629   : > { %1167 = vst [vmem:[#allocation4 + $0x68] sm:$0xff] %v1162_v43  ;;  %1311 = vmatpush.msrb.mxu0 %v1162_v43 }
 0x62f   : > { %v1140_v44 = vpop.permute.xlu1 %1139  ;;  %v1264_v45 = vld [vmem:[#allocation4 + $0x70] sm:$0xff] }
 0x630   : > { %v1142_v46 = vsel %vm547_vm9, %v1948_v9, %v1140_v44  ;;  %1148 = vst.msk [vmem:[#allocation4 + $0x58] sm:$0xff] %vm1087_vm11, %v1140_v44  ;;  %1331 = vmatpush.msrb.mxu1 %v1264_v45  ;;  %vm2057_vm9 = vmmov %vm2056_vm7  ;;  %vm1380_vm11 = vcmask 917248  }
 0x631   : > { %1147 = vst [vmem:[#allocation4 + $0x50] sm:$0xff] %v1142_v46  ;;  %1312 = vmatpush.msrb.mxu0 %v1142_v46 }
 0x633   : > { %1313 = vmatpush.msrb.mxu0 %v1122_v27 }
 0x635   : > { %1314 = vmatpush.msrb.mxu0 %v1102_v31 }
 0x637   : > { %v1261_v47 = vld [vmem:[#allocation4 + $0x58] sm:$0xff]  ;;  %1315 = vmatpush.msrb.mxu0 %v1884_v57  ;;  %v1074_v53 = vpop.permute.xlu1 %1073 }
 0x638   : > { %1332 = vmatpush.msrb.mxu1 %v1261_v47  ;;  %1497 = vmatmul.msk.f32.vlgmr.msrb.gmra.mxu0 %vm2056_vm7, %v1964_v25 }
 0x63a   : > { %1333 = vmatpush.msrb.mxu1 %v1258_v51 }
 0x63c   : > { %1334 = vmatpush.msrb.mxu1 %v1255_v52 }
 0x63e   : > { %1335 = vmatpush.msrb.mxu1 %v1252_v62 }
 0x63f   : > { %1498 = vmatmul.msk.f32.vlgmr.msrb.gmra.mxu1 %vm2057_vm9, %v1964_v25 }
 0x666   : > { %v1297_v54 = vpop.f32.mrf.mxu3 }
 0x667   : > { %v1340_v55 = vmul.f32 %v1297_v54, %v1074_v53 }
 0x669   : > { %v1343_v56 = vadd.f32 %v1340_v55, %v1080_v49 }
 0x66b   : > { %v1346_v57 = vmax.f32 %v1343_v56, 0.0 }
 0x66d   : > { %1362 = vrot.lane.b32.xlu2 %v1346_v57, %s1591_s13  ;;  %1357 = vrot.lane.b32.xlu1 %v1346_v57, %s1592_s14  ;;  %1350 = vst.msk [vmem:[%s1998_s12] sm:$0xff] %vm1349_vm4, %v1346_v57 }
 0x66e   : > { %1352 = vrot.lane.b32.xlu0 %v1346_v57, %s1586_s9  ;;  %s1597_s9 = smov 102  }
 0x675   : > { %1367 = vrot.lane.b32.xlu1 %v1346_v57, %s1593_s15 }
 0x676   : > { %1372 = vrot.lane.b32.xlu0 %v1346_v57, %s1594_s25 }
 0x67d   : > { %1377 = vrot.lane.b32.xlu1 %v1346_v57, %s1595_s16 }
 0x6b5   : > { %v1317_v58 = vpop.f32.mrf.mxu0 }
 0x6b6   : > { %v1341_v50 = vmul.f32 %v1317_v58, %v1074_v53 }
 0x6b8   : > { %v1344_v59 = vadd.f32 %v1341_v50, %v1080_v49 }
 0x6ba   : > { %v1347_v48 = vmax.f32 %v1344_v59, 0.0 }
 0x6bc   : > { %v1337_v60 = vpop.f32.mrf.mxu1  ;;  %1400 = vrot.lane.b32.xlu1 %v1347_v48, %s1580_s27  ;;  %1392 = vrot.lane.b32.xlu2 %v1347_v48, %s1578_s23  ;;  %s1600_s27 = smov 106   ;;  %s1601_s23 = smov 114  }
 0x6bd   : > { %v1342_v61 = vmul.f32 %v1337_v60, %v1074_v53 }
 0x6bf   : > { %v1345_v63 = vadd.f32 %v1342_v61, %v1080_v49 }
 0x6c1   : > { %v1348_v0 = vmax.f32 %v1345_v63, 0.0 }
 0x6c3   : > { %1419 = vrot.lane.b32.xlu0 %v1348_v0, %s1596_s17 }
 0x6c4   : > { %1412 = vrot.lane.b32.xlu1 %v1347_v48, %s1597_s9  ;;  %1408 = vrot.lane.b32.xlu2 %v1347_v48, %s1598_s18 }
 0x6c7   : > { %v1363_v2 = vpop.permute.xlu2 %1362 }
 0x6cb   : > { %1396 = vrot.lane.b32.xlu0 %v1347_v48, %s1579_s26 }
 0x6cc   : > { %1425 = vrot.lane.b32.xlu1 %v1348_v0, %s1599_s19  ;;  %1417 = vrot.lane.b32.xlu2 %v1347_v48, %s1596_s17 }
 0x6d3   : > { %1404 = vrot.lane.b32.xlu0 %v1347_v48, %s1600_s27 }
 0x6d4   : > { %1383 = vrot.lane.b32.xlu2 %v1346_v57, %s1601_s23 }
 0x6db   : > { %1385 = vrot.lane.b32.xlu0 %v1347_v48, %s1601_s23 }
 0x6df   : > { %v1358_v1 = vpop.permute.xlu1 %1357 }
 0x6e0   : > { %v1353_v13 = vpop.permute.xlu0 %1352 }
 0x6e1   : > { %1356 = vst.msk [vmem:[%s1998_s12] sm:$0xff] %vm1355_vm6, %v1353_v13 }
 0x6e2   : > { %1361 = vst.msk [vmem:[%s1998_s12] sm:$0xff] %vm1360_vm14, %v1358_v1 }
 0x6e3   : > { %1366 = vst.msk [vmem:[%s1998_s12] sm:$0xff] %vm1365_vm2, %v1363_v2 }
 0x6e7   : > { %v1368_v3 = vpop.permute.xlu1 %1367 }
 0x6e8   : > { %1371 = vst.msk [vmem:[%s1998_s12] sm:$0xff] %vm1370_vm5, %v1368_v3  ;;  %v1373_v4 = vpop.permute.xlu0 %1372 }
 0x6e9   : > { %1376 = vst.msk [vmem:[%s1998_s12] sm:$0xff] %vm1375_vm10, %v1373_v4 }
 0x6ef   : > { %v1378_v5 = vpop.permute.xlu1 %1377 }
 0x6f0   : > { %1381 = vst.msk [vmem:[%s1998_s12] sm:$0xff] %vm1380_vm11, %v1378_v5 }
 0x716   : > { %v1393_v6 = vpop.permute.xlu2 %1392 }
 0x717   : > { %1395 = vst.msk [vmem:[%s1998_s12 + $0x8] sm:$0xff] %vm1349_vm4, %v1393_v6 }
 0x71e   : > { %v1409_v9 = vpop.permute.xlu2 %1408 }
 0x726   : > { %v1418_v12 = vpop.permute.xlu2 %1417 }
 0x72e   : > { %v1401_v8 = vpop.permute.xlu1 %1400  ;;  %v1384_v17 = vpop.permute.xlu2 %1383 }
 0x735   : > { %v1420_v7 = vpop.permute.xlu0 %1419 }
 0x736   : > { %v1413_v11 = vpop.permute.xlu1 %1412  ;;  %v1422_v15 = vsel %vm1421_vm12, %v1418_v12, %v1420_v7 }
 0x73d   : > { %v1397_v10 = vpop.permute.xlu0 %1396 }
 0x73e   : > { %1399 = vst.msk [vmem:[%s1998_s12 + $0x8] sm:$0xff] %vm1355_vm6, %v1397_v10  ;;  %v1426_v16 = vpop.permute.xlu1 %1425 }
 0x73f   : > { %1403 = vst.msk [vmem:[%s1998_s12 + $0x8] sm:$0xff] %vm1360_vm14, %v1401_v8 }
 0x745   : > { %v1405_v14 = vpop.permute.xlu0 %1404 }
 0x746   : > { %1407 = vst.msk [vmem:[%s1998_s12 + $0x8] sm:$0xff] %vm1365_vm2, %v1405_v14 }
 0x747   : > { %1411 = vst.msk [vmem:[%s1998_s12 + $0x8] sm:$0xff] %vm1370_vm5, %v1409_v9 }
 0x748   : > { %1415 = vst.msk [vmem:[%s1998_s12 + $0x8] sm:$0xff] %vm1375_vm10, %v1413_v11 }
 0x749   : > { %1424 = vst.msk [vmem:[%s1998_s12 + $0x8] sm:$0xff] %vm1380_vm11, %v1422_v15 }
 0x74a   : > { %1428 = vst.msk [vmem:[%s1998_s12 + $0x8] sm:$0xff] %vm1390_vm13, %v1426_v16 }
 0x74d   : > { %v1386_v18 = vpop.permute.xlu0 %1385 }
 0x74e   : > { %v1388_v19 = vsel %vm1387_vm1, %v1384_v17, %v1386_v18 }
 0x74f   : > { %1391 = vst.msk [vmem:[%s1998_s12] sm:$0xff] %vm1390_vm13, %v1388_v19 }
 0x750 PF: > { %s17_s24 = sadd.s32 1, %s1560_s24  }
 0x751   : > { %p14_p4 = scmp.ge.s32.totalorder %s17_s24, 4  }
 0x753   :  { %16 = sbr.rel (!%p14_p4) target bundleno = 1 (0x1), region = 90 }

</bundles_post_ra>
